<compile_context>
chip_gen: v5e
topology: v5e:2x2
jax: 0.10.0
libtpu: 0.0.40
codegen_flags: <defaults>
</compile_context>

<pallas_src>
import functools

import jax
import jax.numpy as jnp
from jax import lax
from jax.experimental import pallas as pl
from jax.experimental.pallas import tpu as pltpu


# ---------------------------------------------------------------------------
# Fused Bottleneck kernel
#   grid = (N, H // TH); each step computes output rows [r*TH, r*TH+TH) of one
#   batch image.  The full image block is resident across the row axis (it is
#   needed for the +/-1 row halo and the identity add); the h1 scratch only
#   holds this tile's TH+2 halo rows.
# ---------------------------------------------------------------------------
def _bottleneck_kernel(x_ref, w1_ref, b1_ref, w2p_ref, b2_ref, w3_ref, b3_ref,
                       out_ref, h1p_ref, *, W, Wp, TH):
    cin = x_ref.shape[-1]
    width = w1_ref.shape[-1]
    cout = w3_ref.shape[-1]
    cdt = h1p_ref.dtype

    r = pl.program_id(1)
    last = pl.num_programs(1) - 1
    row0 = pl.multiple_of(r * TH, TH)

    def conv1(xv):  # (M, cin) bf16 -> (M, width) f32 with bn1 scale folded + relu
        h = jnp.dot(xv, w1_ref[...], preferred_element_type=jnp.float32)
        return jnp.maximum(h + b1_ref[...], 0.0)

    # --- h1 halo scratch: scratch row j holds h1 of image row row0-1+j.
    #     Pad columns [W, Wp) must stay zero: they provide the left/right halo
    #     of the 3x3 conv through the output-roll wrap-around below.
    h1p_ref[:, W:Wp, :] = jnp.zeros((TH + 2, Wp - W, width), cdt)

    x_tile = x_ref[0, pl.ds(row0, TH), :, :]                        # (TH, W, cin)
    # TODO(synk): when W % 8 != 0 (14x14 / 7x7 stages) this (TH, W) flatten
    #             relayouts; chunk the conv1 matmul by sublane tiles there.
    h1 = conv1(x_tile.reshape(TH * W, cin))
    h1p_ref[1:TH + 1, 0:W, :] = h1.reshape(TH, W, width).astype(cdt)

    # top halo row = h1 of image row row0-1, or zero padding at the image top
    @pl.when(r == 0)
    def _():
        h1p_ref[0:1, 0:W, :] = jnp.zeros((1, W, width), cdt)

    @pl.when(r > 0)
    def _():
        xt = x_ref[0, pl.ds(row0 - 1, 1), :, :].reshape(W, cin)
        h1p_ref[0:1, 0:W, :] = conv1(xt).reshape(1, W, width).astype(cdt)

    # bottom halo row = h1 of image row row0+TH, or zero padding at the bottom
    @pl.when(r == last)
    def _():
        h1p_ref[TH + 1:TH + 2, 0:W, :] = jnp.zeros((1, W, width), cdt)

    @pl.when(r < last)
    def _():
        xb = x_ref[0, pl.ds(row0 + TH, 1), :, :].reshape(W, cin)
        h1p_ref[TH + 1:TH + 2, 0:W, :] = conv1(xb).reshape(1, W, width).astype(cdt)

    # --- conv2 (3x3, stride 1, pad 1) + bn2 + relu
    #     3 matmuls (one per kh row tap) with the 3 kw taps packed along the
    #     output-channel (N) dimension; kw column shifts via output rolls.
    M = TH * Wp
    slab = h1p_ref[0:TH, :, :].reshape(M, width)
    y2p = jnp.dot(slab, w2p_ref[0], preferred_element_type=jnp.float32)
    for kh in (1, 2):
        slab = h1p_ref[kh:kh + TH, :, :].reshape(M, width)
        y2p = y2p + jnp.dot(slab, w2p_ref[kh], preferred_element_type=jnp.float32)

    y2 = y2p[:, width:2 * width]                                      # kw=1 (no shift)
    y2 = y2 + pltpu.roll(y2p[:, 0:width], 1, axis=0)                  # kw=0 (+1 col)
    y2 = y2 + pltpu.roll(y2p[:, 2 * width:3 * width], M - 1, axis=0)  # kw=2 (-1 col)
    y2 = jnp.maximum(y2 + b2_ref[...], 0.0)

    # --- conv3 (1x1) + bn3 + residual add + relu
    #     conv3 runs on the full padded width; pad columns dropped at the store.
    y3 = jnp.dot(y2.astype(w3_ref.dtype), w3_ref[...],
                 preferred_element_type=jnp.float32)
    y3 = (y3 + b3_ref[...]).reshape(TH, Wp, cout)[:, 0:W, :]
    # TODO(synk): identity comes from the bf16-cast input (extra skip-path
    #             rounding vs. the f32 PyTorch eval reference).
    out = jnp.maximum(y3 + x_tile.astype(jnp.float32), 0.0)
    out_ref[...] = out.reshape(1, TH, W, cout).astype(out_ref.dtype)


# ---------------------------------------------------------------------------
# Wrapper
# ---------------------------------------------------------------------------
def fold_bn(gamma, beta, mean, var, eps=1e-5):
    scale = gamma / jnp.sqrt(var + eps)
    bias = beta - mean * scale
    return scale[None, :], bias[None, :]


def bottleneck_forward(x_nchw, params, *, tile_rows=16,
                       compute_dtype=jnp.bfloat16, out_dtype=None):
    if out_dtype is None:
        out_dtype = compute_dtype          # bf16 output halves HBM writeback

    x = jnp.transpose(x_nchw, (0, 2, 3, 1))            # NCHW -> NHWC
    N, H, W, cin = x.shape

    w1, w2, w3 = params["w1"], params["w2"], params["w3"]
    width = w1.shape[1]
    cout = w3.shape[1]
    # TODO(synk): downsample / stride>1 path (needs a projection of identity).
    assert cin == cout, "identity add requires inplanes == planes * expansion"

    s1, b1 = fold_bn(*params["bn1"])
    s2, b2 = fold_bn(*params["bn2"])
    s3, b3 = fold_bn(*params["bn3"])
    # Fold BN scale into conv weights (output-channel scaling); bf16 for the MXU.
    w1f = (w1 * s1).astype(compute_dtype)               # (cin, width)
    w3f = (w3 * s3).astype(compute_dtype)               # (width, cout)
    w2f = (w2 * s2).astype(compute_dtype)               # (3, 3, width, width) HWIO
    # Pack the 3 kw taps along output channels: w2p[kh] is (width, 3*width),
    # columns [kw*width, (kw+1)*width) = w2[kh, kw].
    w2p = jnp.transpose(w2f, (0, 2, 1, 3)).reshape(3, width, 3 * width)
    b1 = b1.astype(jnp.float32)
    b2 = b2.astype(jnp.float32)
    b3 = b3.astype(jnp.float32)
    xb = x.astype(compute_dtype)

    th = min(tile_rows, H)
    while H % th:                                       # largest divisor <= tile_rows
        th -= 1
    n_rt = H // th
    Wp = ((W + 2 + 7) // 8) * 8                         # >= W+2, sublane aligned

    csize = jnp.dtype(compute_dtype).itemsize
    flops = 2 * N * H * W * (cin * width + 9 * width * width + width * cout)
    bytes_accessed = (N * H * W * cin * csize
                      + (cin * width + 9 * width * width + width * cout) * csize
                      + 2 * (2 * width + cout) * 4
                      + N * H * W * cout * jnp.dtype(out_dtype).itemsize)
    cost = pl.CostEstimate(flops=flops, transcendentals=0,
                           bytes_accessed=bytes_accessed)

    kernel = functools.partial(_bottleneck_kernel, W=W, Wp=Wp, TH=th)

    def run(single_buffer_consts):
        if single_buffer_consts:
            # Weights/biases never change across the grid -> single-buffer them
            # (recovers one full VMEM copy of the weights).
            def cspec(shape):
                return pl.BlockSpec(shape, lambda n, r: (0,) * len(shape),
                                    pipeline_mode=pl.Buffered(1))
        else:
            def cspec(shape):
                return pl.BlockSpec(shape, lambda n, r: (0,) * len(shape))

        return pl.pallas_call(
            kernel,
            out_shape=jax.ShapeDtypeStruct((N, H, W, cout), out_dtype),
            grid=(N, n_rt),
            in_specs=[
                # full image, resident across the row axis (row halo + identity)
                pl.BlockSpec((1, H, W, cin), lambda n, r: (n, 0, 0, 0)),
                cspec((cin, width)),
                cspec((1, width)),
                cspec((3, width, 3 * width)),
                cspec((1, width)),
                cspec((width, cout)),
                cspec((1, cout)),
            ],
            out_specs=pl.BlockSpec((1, th, W, cout), lambda n, r: (n, r, 0, 0)),
            scratch_shapes=[pltpu.VMEM((th + 2, Wp, width), compute_dtype)],
            compiler_params=pltpu.CompilerParams(
                dimension_semantics=("parallel", "parallel")),
            cost_estimate=cost,
        )(xb, w1f, b1, w2p, b2, w3f, b3)

    try:
        out = run(True)
    except Exception:
        # TODO(synk): pipeline_mode=pl.Buffered(1) unsupported in this jax
        #             version; fall back to default double-buffered constants.
        out = run(False)

    return jnp.transpose(out, (0, 3, 1, 2))             # NHWC -> NCHW


# ---------------------------------------------------------------------------
# Pure-JAX f32 reference (correctness sanity check)
# ---------------------------------------------------------------------------
def bottleneck_reference(x_nchw, params):
    x = jnp.transpose(x_nchw, (0, 2, 3, 1)).astype(jnp.float32)
    dn = ("NHWC", "HWIO", "NHWC")

    def bn(y, bnp):
        s, b = fold_bn(*bnp)
        return y * s[None, :] + b[None, :]

    w1 = params["w1"][None, None]                       # (1,1,cin,width)
    h = lax.conv_general_dilated(x, w1, (1, 1), "VALID", dimension_numbers=dn)
    h = jnp.maximum(bn(h, params["bn1"]), 0.0)
    h = lax.conv_general_dilated(h, params["w2"], (1, 1), [(1, 1), (1, 1)],
                                 dimension_numbers=dn)
    h = jnp.maximum(bn(h, params["bn2"]), 0.0)
    w3 = params["w3"][None, None]
    h = lax.conv_general_dilated(h, w3, (1, 1), "VALID", dimension_numbers=dn)
    h = jnp.maximum(bn(h, params["bn3"]) + x, 0.0)
    return jnp.transpose(h, (0, 3, 1, 2))


# ---------------------------------------------------------------------------
if __name__ == "__main__":
    key = jax.random.PRNGKey(0)

    # Small Bottleneck: inplanes = planes*4 so the identity add is valid
    # without a downsample branch (stride=1, downsample=None).
    planes = 4
    width = planes                      # base_width=64 -> width = planes
    inplanes = planes * 4               # expansion = 4
    N, H, W = 2, 16, 16

    ks = jax.random.split(key, 8)
    x = jax.random.normal(ks[0], (N, inplanes, H, W), dtype=jnp.float32)

    def bn_params(k, c):
        k1, k2, k3, k4 = jax.random.split(k, 4)
        gamma = 1.0 + 0.1 * jax.random.normal(k1, (c,), jnp.float32)
        beta = 0.1 * jax.random.normal(k2, (c,), jnp.float32)
        mean = 0.1 * jax.random.normal(k3, (c,), jnp.float32)
        var = 1.0 + 0.1 * jax.nn.softplus(jax.random.normal(k4, (c,), jnp.float32))
        return (gamma, beta, mean, var)

    params = {
        "w1": 0.2 * jax.random.normal(ks[1], (inplanes, width), jnp.float32),
        "bn1": bn_params(ks[2], width),
        "w2": 0.2 * jax.random.normal(ks[3], (3, 3, width, width), jnp.float32),
        "bn2": bn_params(ks[4], width),
        "w3": 0.2 * jax.random.normal(ks[5], (width, planes * 4), jnp.float32),
        "bn3": bn_params(ks[6], planes * 4),
    }

    ref = jax.block_until_ready(bottleneck_reference(x, params))

    # (a) multi row-tile path (exercises top / middle / bottom halo logic), f32 out.
    out32 = jax.block_until_ready(
        bottleneck_forward(x, params, tile_rows=4, out_dtype=jnp.float32))
    assert out32.shape == (N, inplanes, H, W)
    # bf16 matmul operands + bf16 h1 scratch (f32 accumulation) -> relaxed tolerance.
    assert jnp.allclose(out32, ref, atol=7.5e-2, rtol=7.5e-2), \
        float(jnp.max(jnp.abs(out32 - ref)))

    # (b) default path: largest row tile, bf16 output.
    out16 = jax.block_until_ready(bottleneck_forward(x, params))
    assert out16.shape == (N, inplanes, H, W)
    assert out16.dtype == jnp.bfloat16
    out16 = out16.astype(jnp.float32)
    assert jnp.allclose(out16, ref, atol=1.5e-1, rtol=1.5e-1), \
        float(jnp.max(jnp.abs(out16 - ref)))

    print("KERNEL_OK")
</pallas_src>

<mosaic_0001>
module attributes {stable_mosaic.version = 11 : i64} {
  func.func @_bottleneck_kernel(%arg0: i32, %arg1: i32, %arg2: memref<1x16x16x16xbf16, #tpu.memory_space<vmem>>, %arg3: memref<16x4xbf16, #tpu.memory_space<vmem>>, %arg4: memref<1x4xf32, #tpu.memory_space<vmem>>, %arg5: memref<3x4x12xbf16, #tpu.memory_space<vmem>>, %arg6: memref<1x4xf32, #tpu.memory_space<vmem>>, %arg7: memref<4x16xbf16, #tpu.memory_space<vmem>>, %arg8: memref<1x16xf32, #tpu.memory_space<vmem>>, %arg9: memref<1x4x16x16xf32, #tpu.memory_space<vmem>>, %arg10: memref<6x24x4xbf16, #tpu.memory_space<vmem>>) attributes {dimension_semantics = [#tpu.dimension_semantics<parallel>, #tpu.dimension_semantics<parallel>], iteration_bounds = array<i64: 2, 4>, scalar_prefetch = 0 : i64, scratch_operands = 1 : i64, tpu.core_type = #tpu.core_type<tc>, window_params = [{transform_indices = @transform_0, window_bounds = array<i64: 1, 16, 16, 16>}, {pipeline_mode = #tpu.pipeline_mode<synchronous>, transform_indices = @transform_1, window_bounds = array<i64: 16, 4>}, {pipeline_mode = #tpu.pipeline_mode<synchronous>, transform_indices = @transform_2, window_bounds = array<i64: 1, 4>}, {pipeline_mode = #tpu.pipeline_mode<synchronous>, transform_indices = @transform_3, window_bounds = array<i64: 3, 4, 12>}, {pipeline_mode = #tpu.pipeline_mode<synchronous>, transform_indices = @transform_4, window_bounds = array<i64: 1, 4>}, {pipeline_mode = #tpu.pipeline_mode<synchronous>, transform_indices = @transform_5, window_bounds = array<i64: 4, 16>}, {pipeline_mode = #tpu.pipeline_mode<synchronous>, transform_indices = @transform_6, window_bounds = array<i64: 1, 16>}, {transform_indices = @transform_7, window_bounds = array<i64: 1, 4, 16, 16>}]} {
    %c4_i32 = arith.constant 4 : i32
    %0 = arith.muli %arg1, %c4_i32 : i32
    %1 = tpu.assume_multiple %0, 4 : i32
    %cst = arith.constant 0.000000e+00 : bf16
    %2 = vector.broadcast %cst : bf16 to vector<6x8x4xbf16>
    %c0 = arith.constant 0 : index
    %c16 = arith.constant 16 : index
    %c0_0 = arith.constant 0 : index
    %3 = vector.load %arg10[%c0, %c16, %c0_0] : memref<6x24x4xbf16, #tpu.memory_space<vmem>>, vector<6x8x4xbf16>
    tpu.vector_store %arg10[%c0, %c16, %c0_0], %2 {strides = array<i32>} : memref<6x24x4xbf16, #tpu.memory_space<vmem>>, vector<6x8x4xbf16>,
    %c0_1 = arith.constant 0 : index
    %4 = arith.index_cast %1 : i32 to index
    %c0_2 = arith.constant 0 : index
    %c0_3 = arith.constant 0 : index
    %5 = vector.load %arg2[%c0_1, %4, %c0_2, %c0_3] : memref<1x16x16x16xbf16, #tpu.memory_space<vmem>>, vector<1x4x16x16xbf16>
    %6 = vector.shape_cast %5 : vector<1x4x16x16xbf16> to vector<4x16x16xbf16>
    %7 = vector.shape_cast %6 : vector<4x16x16xbf16> to vector<64x16xbf16>
    %c0_4 = arith.constant 0 : index
    %c0_5 = arith.constant 0 : index
    %8 = vector.load %arg3[%c0_4, %c0_5] : memref<16x4xbf16, #tpu.memory_space<vmem>>, vector<16x4xbf16>
    %cst_6 = arith.constant dense<0.000000e+00> : vector<64x4xf32>
    %9 = tpu.matmul %7, %8, %cst_6 {dimension_numbers = #tpu.dot_dimension_numbers<[1], [0], [0], [1], [0, 0, 1, 1], [], []>} : vector<64x16xbf16>, vector<16x4xbf16>, vector<64x4xf32> -> vector<64x4xf32>
    %c0_7 = arith.constant 0 : index
    %c0_8 = arith.constant 0 : index
    %10 = vector.load %arg4[%c0_7, %c0_8] : memref<1x4xf32, #tpu.memory_space<vmem>>, vector<1x4xf32>
    %11 = vector.broadcast %10 : vector<1x4xf32> to vector<64x4xf32>
    %12 = arith.addf %9, %11 : vector<64x4xf32>
    %cst_9 = arith.constant 0.000000e+00 : f32
    %13 = vector.broadcast %cst_9 : f32 to vector<64x4xf32>
    %14 = arith.maximumf %12, %13 : vector<64x4xf32>
    %15 = vector.shape_cast %14 : vector<64x4xf32> to vector<4x16x4xf32>
    %16 = arith.truncf %15 : vector<4x16x4xf32> to vector<4x16x4xbf16>
    %c1 = arith.constant 1 : index
    %c0_10 = arith.constant 0 : index
    %c0_11 = arith.constant 0 : index
    %17 = vector.load %arg10[%c1, %c0_10, %c0_11] : memref<6x24x4xbf16, #tpu.memory_space<vmem>>, vector<4x16x4xbf16>
    tpu.vector_store %arg10[%c1, %c0_10, %c0_11], %16 {strides = array<i32>} : memref<6x24x4xbf16, #tpu.memory_space<vmem>>, vector<4x16x4xbf16>,
    %c0_i32 = arith.constant 0 : i32
    %18 = arith.cmpi eq, %arg1, %c0_i32 : i32
    %19 = arith.extui %18 : i1 to i32
    %c0_i32_12 = arith.constant 0 : i32
    %20 = arith.cmpi ne, %19, %c0_i32_12 : i32
    scf.if %20 {
      %cst_51 = arith.constant 0.000000e+00 : bf16
      %73 = vector.broadcast %cst_51 : bf16 to vector<1x16x4xbf16>
      %c0_52 = arith.constant 0 : index
      %c0_53 = arith.constant 0 : index
      %c0_54 = arith.constant 0 : index
      %74 = vector.load %arg10[%c0_52, %c0_53, %c0_54] : memref<6x24x4xbf16, #tpu.memory_space<vmem>>, vector<1x16x4xbf16>
      tpu.vector_store %arg10[%c0_52, %c0_53, %c0_54], %73 {strides = array<i32>} : memref<6x24x4xbf16, #tpu.memory_space<vmem>>, vector<1x16x4xbf16>,
    } else {
    }
    %c0_i32_13 = arith.constant 0 : i32
    %21 = arith.cmpi sgt, %arg1, %c0_i32_13 : i32
    %22 = arith.extui %21 : i1 to i32
    %c0_i32_14 = arith.constant 0 : i32
    %23 = arith.cmpi ne, %22, %c0_i32_14 : i32
    scf.if %23 {
      %c1_i32_51 = arith.constant 1 : i32
      %73 = arith.subi %1, %c1_i32_51 : i32
      %c0_52 = arith.constant 0 : index
      %74 = arith.index_cast %73 : i32 to index
      %c0_53 = arith.constant 0 : index
      %c0_54 = arith.constant 0 : index
      %75 = vector.load %arg2[%c0_52, %74, %c0_53, %c0_54] : memref<1x16x16x16xbf16, #tpu.memory_space<vmem>>, vector<1x1x16x16xbf16>
      %76 = vector.shape_cast %75 : vector<1x1x16x16xbf16> to vector<1x16x16xbf16>
      %77 = vector.shape_cast %76 : vector<1x16x16xbf16> to vector<16x16xbf16>
      %c0_55 = arith.constant 0 : index
      %c0_56 = arith.constant 0 : index
      %78 = vector.load %arg3[%c0_55, %c0_56] : memref<16x4xbf16, #tpu.memory_space<vmem>>, vector<16x4xbf16>
      %cst_57 = arith.constant dense<0.000000e+00> : vector<16x4xf32>
      %79 = tpu.matmul %77, %78, %cst_57 {dimension_numbers = #tpu.dot_dimension_numbers<[1], [0], [0], [1], [0, 0, 1, 1], [], []>} : vector<16x16xbf16>, vector<16x4xbf16>, vector<16x4xf32> -> vector<16x4xf32>
      %c0_58 = arith.constant 0 : index
      %c0_59 = arith.constant 0 : index
      %80 = vector.load %arg4[%c0_58, %c0_59] : memref<1x4xf32, #tpu.memory_space<vmem>>, vector<1x4xf32>
      %81 = vector.broadcast %80 : vector<1x4xf32> to vector<16x4xf32>
      %82 = arith.addf %79, %81 : vector<16x4xf32>
      %cst_60 = arith.constant 0.000000e+00 : f32
      %83 = vector.broadcast %cst_60 : f32 to vector<16x4xf32>
      %84 = arith.maximumf %82, %83 : vector<16x4xf32>
      %85 = vector.shape_cast %84 : vector<16x4xf32> to vector<1x16x4xf32>
      %86 = arith.truncf %85 : vector<1x16x4xf32> to vector<1x16x4xbf16>
      %c0_61 = arith.constant 0 : index
      %c0_62 = arith.constant 0 : index
      %c0_63 = arith.constant 0 : index
      %87 = vector.load %arg10[%c0_61, %c0_62, %c0_63] : memref<6x24x4xbf16, #tpu.memory_space<vmem>>, vector<1x16x4xbf16>
      tpu.vector_store %arg10[%c0_61, %c0_62, %c0_63], %86 {strides = array<i32>} : memref<6x24x4xbf16, #tpu.memory_space<vmem>>, vector<1x16x4xbf16>,
    } else {
    }
    %c3_i32 = arith.constant 3 : i32
    %24 = arith.cmpi eq, %arg1, %c3_i32 : i32
    %25 = arith.extui %24 : i1 to i32
    %c0_i32_15 = arith.constant 0 : i32
    %26 = arith.cmpi ne, %25, %c0_i32_15 : i32
    scf.if %26 {
      %cst_51 = arith.constant 0.000000e+00 : bf16
      %73 = vector.broadcast %cst_51 : bf16 to vector<1x16x4xbf16>
      %c5 = arith.constant 5 : index
      %c0_52 = arith.constant 0 : index
      %c0_53 = arith.constant 0 : index
      %74 = vector.load %arg10[%c5, %c0_52, %c0_53] : memref<6x24x4xbf16, #tpu.memory_space<vmem>>, vector<1x16x4xbf16>
      tpu.vector_store %arg10[%c5, %c0_52, %c0_53], %73 {strides = array<i32>} : memref<6x24x4xbf16, #tpu.memory_space<vmem>>, vector<1x16x4xbf16>,
    } else {
    }
    %c3_i32_16 = arith.constant 3 : i32
    %27 = arith.cmpi slt, %arg1, %c3_i32_16 : i32
    %28 = arith.extui %27 : i1 to i32
    %c0_i32_17 = arith.constant 0 : i32
    %29 = arith.cmpi ne, %28, %c0_i32_17 : i32
    scf.if %29 {
      %c4_i32_51 = arith.constant 4 : i32
      %73 = arith.addi %1, %c4_i32_51 : i32
      %c0_52 = arith.constant 0 : index
      %74 = arith.index_cast %73 : i32 to index
      %c0_53 = arith.constant 0 : index
      %c0_54 = arith.constant 0 : index
      %75 = vector.load %arg2[%c0_52, %74, %c0_53, %c0_54] : memref<1x16x16x16xbf16, #tpu.memory_space<vmem>>, vector<1x1x16x16xbf16>
      %76 = vector.shape_cast %75 : vector<1x1x16x16xbf16> to vector<1x16x16xbf16>
      %77 = vector.shape_cast %76 : vector<1x16x16xbf16> to vector<16x16xbf16>
      %c0_55 = arith.constant 0 : index
      %c0_56 = arith.constant 0 : index
      %78 = vector.load %arg3[%c0_55, %c0_56] : memref<16x4xbf16, #tpu.memory_space<vmem>>, vector<16x4xbf16>
      %cst_57 = arith.constant dense<0.000000e+00> : vector<16x4xf32>
      %79 = tpu.matmul %77, %78, %cst_57 {dimension_numbers = #tpu.dot_dimension_numbers<[1], [0], [0], [1], [0, 0, 1, 1], [], []>} : vector<16x16xbf16>, vector<16x4xbf16>, vector<16x4xf32> -> vector<16x4xf32>
      %c0_58 = arith.constant 0 : index
      %c0_59 = arith.constant 0 : index
      %80 = vector.load %arg4[%c0_58, %c0_59] : memref<1x4xf32, #tpu.memory_space<vmem>>, vector<1x4xf32>
      %81 = vector.broadcast %80 : vector<1x4xf32> to vector<16x4xf32>
      %82 = arith.addf %79, %81 : vector<16x4xf32>
      %cst_60 = arith.constant 0.000000e+00 : f32
      %83 = vector.broadcast %cst_60 : f32 to vector<16x4xf32>
      %84 = arith.maximumf %82, %83 : vector<16x4xf32>
      %85 = vector.shape_cast %84 : vector<16x4xf32> to vector<1x16x4xf32>
      %86 = arith.truncf %85 : vector<1x16x4xf32> to vector<1x16x4xbf16>
      %c5 = arith.constant 5 : index
      %c0_61 = arith.constant 0 : index
      %c0_62 = arith.constant 0 : index
      %87 = vector.load %arg10[%c5, %c0_61, %c0_62] : memref<6x24x4xbf16, #tpu.memory_space<vmem>>, vector<1x16x4xbf16>
      tpu.vector_store %arg10[%c5, %c0_61, %c0_62], %86 {strides = array<i32>} : memref<6x24x4xbf16, #tpu.memory_space<vmem>>, vector<1x16x4xbf16>,
    } else {
    }
    %c0_18 = arith.constant 0 : index
    %c0_19 = arith.constant 0 : index
    %c0_20 = arith.constant 0 : index
    %30 = vector.load %arg10[%c0_18, %c0_19, %c0_20] : memref<6x24x4xbf16, #tpu.memory_space<vmem>>, vector<4x24x4xbf16>
    %31 = vector.shape_cast %30 : vector<4x24x4xbf16> to vector<96x4xbf16>
    %c0_21 = arith.constant 0 : index
    %c0_22 = arith.constant 0 : index
    %c0_23 = arith.constant 0 : index
    %32 = vector.load %arg5[%c0_21, %c0_22, %c0_23] : memref<3x4x12xbf16, #tpu.memory_space<vmem>>, vector<1x4x12xbf16>
    %33 = vector.shape_cast %32 : vector<1x4x12xbf16> to vector<4x12xbf16>
    %cst_24 = arith.constant dense<0.000000e+00> : vector<96x12xf32>
    %34 = tpu.matmul %31, %33, %cst_24 {dimension_numbers = #tpu.dot_dimension_numbers<[1], [0], [0], [1], [0, 0, 1, 1], [], []>} : vector<96x4xbf16>, vector<4x12xbf16>, vector<96x12xf32> -> vector<96x12xf32>
    %c1_25 = arith.constant 1 : index
    %c0_26 = arith.constant 0 : index
    %c0_27 = arith.constant 0 : index
    %35 = vector.load %arg10[%c1_25, %c0_26, %c0_27] : memref<6x24x4xbf16, #tpu.memory_space<vmem>>, vector<4x24x4xbf16>
    %36 = vector.shape_cast %35 : vector<4x24x4xbf16> to vector<96x4xbf16>
    %c1_28 = arith.constant 1 : index
    %c0_29 = arith.constant 0 : index
    %c0_30 = arith.constant 0 : index
    %37 = vector.load %arg5[%c1_28, %c0_29, %c0_30] : memref<3x4x12xbf16, #tpu.memory_space<vmem>>, vector<1x4x12xbf16>
    %38 = vector.shape_cast %37 : vector<1x4x12xbf16> to vector<4x12xbf16>
    %cst_31 = arith.constant dense<0.000000e+00> : vector<96x12xf32>
    %39 = tpu.matmul %36, %38, %cst_31 {dimension_numbers = #tpu.dot_dimension_numbers<[1], [0], [0], [1], [0, 0, 1, 1], [], []>} : vector<96x4xbf16>, vector<4x12xbf16>, vector<96x12xf32> -> vector<96x12xf32>
    %40 = arith.addf %34, %39 : vector<96x12xf32>
    %c2 = arith.constant 2 : index
    %c0_32 = arith.constant 0 : index
    %c0_33 = arith.constant 0 : index
    %41 = vector.load %arg10[%c2, %c0_32, %c0_33] : memref<6x24x4xbf16, #tpu.memory_space<vmem>>, vector<4x24x4xbf16>
    %42 = vector.shape_cast %41 : vector<4x24x4xbf16> to vector<96x4xbf16>
    %c2_34 = arith.constant 2 : index
    %c0_35 = arith.constant 0 : index
    %c0_36 = arith.constant 0 : index
    %43 = vector.load %arg5[%c2_34, %c0_35, %c0_36] : memref<3x4x12xbf16, #tpu.memory_space<vmem>>, vector<1x4x12xbf16>
    %44 = vector.shape_cast %43 : vector<1x4x12xbf16> to vector<4x12xbf16>
    %cst_37 = arith.constant dense<0.000000e+00> : vector<96x12xf32>
    %45 = tpu.matmul %42, %44, %cst_37 {dimension_numbers = #tpu.dot_dimension_numbers<[1], [0], [0], [1], [0, 0, 1, 1], [], []>} : vector<96x4xbf16>, vector<4x12xbf16>, vector<96x12xf32> -> vector<96x12xf32>
    %46 = arith.addf %40, %45 : vector<96x12xf32>
    %47 = vector.extract_strided_slice %46 {offsets = [0, 4], sizes = [96, 4], strides = [1, 1]} : vector<96x12xf32> to vector<96x4xf32>
    %48 = vector.extract_strided_slice %46 {offsets = [0, 0], sizes = [96, 4], strides = [1, 1]} : vector<96x12xf32> to vector<96x4xf32>
    %c1_i32 = arith.constant 1 : i32
    %49 = tpu.dynamic_rotate %48 by %c1_i32 dim 0 : vector<96x4xf32>, i32 -> vector<96x4xf32>
    %50 = arith.addf %47, %49 : vector<96x4xf32>
    %51 = vector.extract_strided_slice %46 {offsets = [0, 8], sizes = [96, 4], strides = [1, 1]} : vector<96x12xf32> to vector<96x4xf32>
    %c95_i32 = arith.constant 95 : i32
    %52 = tpu.dynamic_rotate %51 by %c95_i32 dim 0 : vector<96x4xf32>, i32 -> vector<96x4xf32>
    %53 = arith.addf %50, %52 : vector<96x4xf32>
    %c0_38 = arith.constant 0 : index
    %c0_39 = arith.constant 0 : index
    %54 = vector.load %arg6[%c0_38, %c0_39] : memref<1x4xf32, #tpu.memory_space<vmem>>, vector<1x4xf32>
    %55 = vector.broadcast %54 : vector<1x4xf32> to vector<96x4xf32>
    %56 = arith.addf %53, %55 : vector<96x4xf32>
    %cst_40 = arith.constant 0.000000e+00 : f32
    %57 = vector.broadcast %cst_40 : f32 to vector<96x4xf32>
    %58 = arith.maximumf %56, %57 : vector<96x4xf32>
    %59 = arith.truncf %58 : vector<96x4xf32> to vector<96x4xbf16>
    %c0_41 = arith.constant 0 : index
    %c0_42 = arith.constant 0 : index
    %60 = vector.load %arg7[%c0_41, %c0_42] : memref<4x16xbf16, #tpu.memory_space<vmem>>, vector<4x16xbf16>
    %cst_43 = arith.constant dense<0.000000e+00> : vector<96x16xf32>
    %61 = tpu.matmul %59, %60, %cst_43 {dimension_numbers = #tpu.dot_dimension_numbers<[1], [0], [0], [1], [0, 0, 1, 1], [], []>} : vector<96x4xbf16>, vector<4x16xbf16>, vector<96x16xf32> -> vector<96x16xf32>
    %c0_44 = arith.constant 0 : index
    %c0_45 = arith.constant 0 : index
    %62 = vector.load %arg8[%c0_44, %c0_45] : memref<1x16xf32, #tpu.memory_space<vmem>>, vector<1x16xf32>
    %63 = vector.broadcast %62 : vector<1x16xf32> to vector<96x16xf32>
    %64 = arith.addf %61, %63 : vector<96x16xf32>
    %65 = vector.shape_cast %64 : vector<96x16xf32> to vector<4x24x16xf32>
    %66 = vector.extract_strided_slice %65 {offsets = [0, 0, 0], sizes = [4, 16, 16], strides = [1, 1, 1]} : vector<4x24x16xf32> to vector<4x16x16xf32>
    %67 = arith.extf %6 : vector<4x16x16xbf16> to vector<4x16x16xf32>
    %68 = arith.addf %66, %67 : vector<4x16x16xf32>
    %cst_46 = arith.constant 0.000000e+00 : f32
    %69 = vector.broadcast %cst_46 : f32 to vector<4x16x16xf32>
    %70 = arith.maximumf %68, %69 : vector<4x16x16xf32>
    %71 = vector.shape_cast %70 : vector<4x16x16xf32> to vector<1x4x16x16xf32>
    %c0_47 = arith.constant 0 : index
    %c0_48 = arith.constant 0 : index
    %c0_49 = arith.constant 0 : index
    %c0_50 = arith.constant 0 : index
    %72 = vector.load %arg9[%c0_47, %c0_48, %c0_49, %c0_50] : memref<1x4x16x16xf32, #tpu.memory_space<vmem>>, vector<1x4x16x16xf32>
    tpu.vector_store %arg9[%c0_47, %c0_48, %c0_49, %c0_50], %71 {strides = array<i32>} : memref<1x4x16x16xf32, #tpu.memory_space<vmem>>, vector<1x4x16x16xf32>,
    return
  }
  func.func @transform_0(%arg0: i32, %arg1: i32) -> (i32, i32, i32, i32) {
    %c0_i32 = arith.constant 0 : i32
    %c0_i32_0 = arith.constant 0 : i32
    %c0_i32_1 = arith.constant 0 : i32
    %c0_i32_2 = arith.constant 0 : i32
    return %arg0, %c0_i32, %c0_i32_0, %c0_i32_1 : i32, i32, i32, i32
  }
  func.func @transform_1(%arg0: i32, %arg1: i32) -> (i32, i32) {
    %c0_i32 = arith.constant 0 : i32
    %c0_i32_0 = arith.constant 0 : i32
    %c0_i32_1 = arith.constant 0 : i32
    return %c0_i32, %c0_i32_0 : i32, i32
  }
  func.func @transform_2(%arg0: i32, %arg1: i32) -> (i32, i32) {
    %c0_i32 = arith.constant 0 : i32
    %c0_i32_0 = arith.constant 0 : i32
    %c0_i32_1 = arith.constant 0 : i32
    return %c0_i32, %c0_i32_0 : i32, i32
  }
  func.func @transform_3(%arg0: i32, %arg1: i32) -> (i32, i32, i32) {
    %c0_i32 = arith.constant 0 : i32
    %c0_i32_0 = arith.constant 0 : i32
    %c0_i32_1 = arith.constant 0 : i32
    %c0_i32_2 = arith.constant 0 : i32
    return %c0_i32, %c0_i32_0, %c0_i32_1 : i32, i32, i32
  }
  func.func @transform_4(%arg0: i32, %arg1: i32) -> (i32, i32) {
    %c0_i32 = arith.constant 0 : i32
    %c0_i32_0 = arith.constant 0 : i32
    %c0_i32_1 = arith.constant 0 : i32
    return %c0_i32, %c0_i32_0 : i32, i32
  }
  func.func @transform_5(%arg0: i32, %arg1: i32) -> (i32, i32) {
    %c0_i32 = arith.constant 0 : i32
    %c0_i32_0 = arith.constant 0 : i32
    %c0_i32_1 = arith.constant 0 : i32
    return %c0_i32, %c0_i32_0 : i32, i32
  }
  func.func @transform_6(%arg0: i32, %arg1: i32) -> (i32, i32) {
    %c0_i32 = arith.constant 0 : i32
    %c0_i32_0 = arith.constant 0 : i32
    %c0_i32_1 = arith.constant 0 : i32
    return %c0_i32, %c0_i32_0 : i32, i32
  }
  func.func @transform_7(%arg0: i32, %arg1: i32) -> (i32, i32, i32, i32) {
    %c0_i32 = arith.constant 0 : i32
    %c0_i32_0 = arith.constant 0 : i32
    %c0_i32_1 = arith.constant 0 : i32
    return %arg0, %arg1, %c0_i32, %c0_i32_0 : i32, i32, i32, i32
  }
}

module attributes {stable_mosaic.version = 11 : i64} {
  func.func @_bottleneck_kernel(%arg0: i32, %arg1: i32, %arg2: memref<1x16x16x16xbf16, #tpu.memory_space<vmem>>, %arg3: memref<16x4xbf16, #tpu.memory_space<vmem>>, %arg4: memref<1x4xf32, #tpu.memory_space<vmem>>, %arg5: memref<3x4x12xbf16, #tpu.memory_space<vmem>>, %arg6: memref<1x4xf32, #tpu.memory_space<vmem>>, %arg7: memref<4x16xbf16, #tpu.memory_space<vmem>>, %arg8: memref<1x16xf32, #tpu.memory_space<vmem>>, %arg9: memref<1x4x16x16xf32, #tpu.memory_space<vmem>>, %arg10: memref<6x24x4xbf16, #tpu.memory_space<vmem>>) attributes {dimension_semantics = [#tpu.dimension_semantics<parallel>, #tpu.dimension_semantics<parallel>], iteration_bounds = array<i64: 2, 4>, scalar_prefetch = 0 : i64, scratch_operands = 1 : i64, tpu.core_type = #tpu.core_type<tc>, window_params = [{transform_indices = @transform_0, window_bounds = array<i64: 1, 16, 16, 16>}, {pipeline_mode = #tpu.pipeline_mode<synchronous>, transform_indices = @transform_1, window_bounds = array<i64: 16, 4>}, {pipeline_mode = #tpu.pipeline_mode<synchronous>, transform_indices = @transform_2, window_bounds = array<i64: 1, 4>}, {pipeline_mode = #tpu.pipeline_mode<synchronous>, transform_indices = @transform_3, window_bounds = array<i64: 3, 4, 12>}, {pipeline_mode = #tpu.pipeline_mode<synchronous>, transform_indices = @transform_4, window_bounds = array<i64: 1, 4>}, {pipeline_mode = #tpu.pipeline_mode<synchronous>, transform_indices = @transform_5, window_bounds = array<i64: 4, 16>}, {pipeline_mode = #tpu.pipeline_mode<synchronous>, transform_indices = @transform_6, window_bounds = array<i64: 1, 16>}, {transform_indices = @transform_7, window_bounds = array<i64: 1, 4, 16, 16>}]} {
    %c4_i32 = arith.constant 4 : i32
    %0 = arith.muli %arg1, %c4_i32 : i32
    %1 = tpu.assume_multiple %0, 4 : i32
    %cst = arith.constant 0.000000e+00 : bf16
    %2 = vector.broadcast %cst : bf16 to vector<6x8x4xbf16>
    %c0 = arith.constant 0 : index
    %c16 = arith.constant 16 : index
    %c0_0 = arith.constant 0 : index
    %3 = vector.load %arg10[%c0, %c16, %c0_0] : memref<6x24x4xbf16, #tpu.memory_space<vmem>>, vector<6x8x4xbf16>
    tpu.vector_store %arg10[%c0, %c16, %c0_0], %2 {strides = array<i32>} : memref<6x24x4xbf16, #tpu.memory_space<vmem>>, vector<6x8x4xbf16>,
    %c0_1 = arith.constant 0 : index
    %4 = arith.index_cast %1 : i32 to index
    %c0_2 = arith.constant 0 : index
    %c0_3 = arith.constant 0 : index
    %5 = vector.load %arg2[%c0_1, %4, %c0_2, %c0_3] : memref<1x16x16x16xbf16, #tpu.memory_space<vmem>>, vector<1x4x16x16xbf16>
    %6 = vector.shape_cast %5 : vector<1x4x16x16xbf16> to vector<4x16x16xbf16>
    %7 = vector.shape_cast %6 : vector<4x16x16xbf16> to vector<64x16xbf16>
    %c0_4 = arith.constant 0 : index
    %c0_5 = arith.constant 0 : index
    %8 = vector.load %arg3[%c0_4, %c0_5] : memref<16x4xbf16, #tpu.memory_space<vmem>>, vector<16x4xbf16>
    %cst_6 = arith.constant dense<0.000000e+00> : vector<64x4xf32>
    %9 = tpu.matmul %7, %8, %cst_6 {dimension_numbers = #tpu.dot_dimension_numbers<[1], [0], [0], [1], [0, 0, 1, 1], [], []>} : vector<64x16xbf16>, vector<16x4xbf16>, vector<64x4xf32> -> vector<64x4xf32>
    %c0_7 = arith.constant 0 : index
    %c0_8 = arith.constant 0 : index
    %10 = vector.load %arg4[%c0_7, %c0_8] : memref<1x4xf32, #tpu.memory_space<vmem>>, vector<1x4xf32>
    %11 = vector.broadcast %10 : vector<1x4xf32> to vector<64x4xf32>
    %12 = arith.addf %9, %11 : vector<64x4xf32>
    %cst_9 = arith.constant 0.000000e+00 : f32
    %13 = vector.broadcast %cst_9 : f32 to vector<64x4xf32>
    %14 = arith.maximumf %12, %13 : vector<64x4xf32>
    %15 = vector.shape_cast %14 : vector<64x4xf32> to vector<4x16x4xf32>
    %16 = arith.truncf %15 : vector<4x16x4xf32> to vector<4x16x4xbf16>
    %c1 = arith.constant 1 : index
    %c0_10 = arith.constant 0 : index
    %c0_11 = arith.constant 0 : index
    %17 = vector.load %arg10[%c1, %c0_10, %c0_11] : memref<6x24x4xbf16, #tpu.memory_space<vmem>>, vector<4x16x4xbf16>
    tpu.vector_store %arg10[%c1, %c0_10, %c0_11], %16 {strides = array<i32>} : memref<6x24x4xbf16, #tpu.memory_space<vmem>>, vector<4x16x4xbf16>,
    %c0_i32 = arith.constant 0 : i32
    %18 = arith.cmpi eq, %arg1, %c0_i32 : i32
    %19 = arith.extui %18 : i1 to i32
    %c0_i32_12 = arith.constant 0 : i32
    %20 = arith.cmpi ne, %19, %c0_i32_12 : i32
    scf.if %20 {
      %cst_51 = arith.constant 0.000000e+00 : bf16
      %73 = vector.broadcast %cst_51 : bf16 to vector<1x16x4xbf16>
      %c0_52 = arith.constant 0 : index
      %c0_53 = arith.constant 0 : index
      %c0_54 = arith.constant 0 : index
      %74 = vector.load %arg10[%c0_52, %c0_53, %c0_54] : memref<6x24x4xbf16, #tpu.memory_space<vmem>>, vector<1x16x4xbf16>
      tpu.vector_store %arg10[%c0_52, %c0_53, %c0_54], %73 {strides = array<i32>} : memref<6x24x4xbf16, #tpu.memory_space<vmem>>, vector<1x16x4xbf16>,
    } else {
    }
    %c0_i32_13 = arith.constant 0 : i32
    %21 = arith.cmpi sgt, %arg1, %c0_i32_13 : i32
    %22 = arith.extui %21 : i1 to i32
    %c0_i32_14 = arith.constant 0 : i32
    %23 = arith.cmpi ne, %22, %c0_i32_14 : i32
    scf.if %23 {
      %c1_i32_51 = arith.constant 1 : i32
      %73 = arith.subi %1, %c1_i32_51 : i32
      %c0_52 = arith.constant 0 : index
      %74 = arith.index_cast %73 : i32 to index
      %c0_53 = arith.constant 0 : index
      %c0_54 = arith.constant 0 : index
      %75 = vector.load %arg2[%c0_52, %74, %c0_53, %c0_54] : memref<1x16x16x16xbf16, #tpu.memory_space<vmem>>, vector<1x1x16x16xbf16>
      %76 = vector.shape_cast %75 : vector<1x1x16x16xbf16> to vector<1x16x16xbf16>
      %77 = vector.shape_cast %76 : vector<1x16x16xbf16> to vector<16x16xbf16>
      %c0_55 = arith.constant 0 : index
      %c0_56 = arith.constant 0 : index
      %78 = vector.load %arg3[%c0_55, %c0_56] : memref<16x4xbf16, #tpu.memory_space<vmem>>, vector<16x4xbf16>
      %cst_57 = arith.constant dense<0.000000e+00> : vector<16x4xf32>
      %79 = tpu.matmul %77, %78, %cst_57 {dimension_numbers = #tpu.dot_dimension_numbers<[1], [0], [0], [1], [0, 0, 1, 1], [], []>} : vector<16x16xbf16>, vector<16x4xbf16>, vector<16x4xf32> -> vector<16x4xf32>
      %c0_58 = arith.constant 0 : index
      %c0_59 = arith.constant 0 : index
      %80 = vector.load %arg4[%c0_58, %c0_59] : memref<1x4xf32, #tpu.memory_space<vmem>>, vector<1x4xf32>
      %81 = vector.broadcast %80 : vector<1x4xf32> to vector<16x4xf32>
      %82 = arith.addf %79, %81 : vector<16x4xf32>
      %cst_60 = arith.constant 0.000000e+00 : f32
      %83 = vector.broadcast %cst_60 : f32 to vector<16x4xf32>
      %84 = arith.maximumf %82, %83 : vector<16x4xf32>
      %85 = vector.shape_cast %84 : vector<16x4xf32> to vector<1x16x4xf32>
      %86 = arith.truncf %85 : vector<1x16x4xf32> to vector<1x16x4xbf16>
      %c0_61 = arith.constant 0 : index
      %c0_62 = arith.constant 0 : index
      %c0_63 = arith.constant 0 : index
      %87 = vector.load %arg10[%c0_61, %c0_62, %c0_63] : memref<6x24x4xbf16, #tpu.memory_space<vmem>>, vector<1x16x4xbf16>
      tpu.vector_store %arg10[%c0_61, %c0_62, %c0_63], %86 {strides = array<i32>} : memref<6x24x4xbf16, #tpu.memory_space<vmem>>, vector<1x16x4xbf16>,
    } else {
    }
    %c3_i32 = arith.constant 3 : i32
    %24 = arith.cmpi eq, %arg1, %c3_i32 : i32
    %25 = arith.extui %24 : i1 to i32
    %c0_i32_15 = arith.constant 0 : i32
    %26 = arith.cmpi ne, %25, %c0_i32_15 : i32
    scf.if %26 {
      %cst_51 = arith.constant 0.000000e+00 : bf16
      %73 = vector.broadcast %cst_51 : bf16 to vector<1x16x4xbf16>
      %c5 = arith.constant 5 : index
      %c0_52 = arith.constant 0 : index
      %c0_53 = arith.constant 0 : index
      %74 = vector.load %arg10[%c5, %c0_52, %c0_53] : memref<6x24x4xbf16, #tpu.memory_space<vmem>>, vector<1x16x4xbf16>
      tpu.vector_store %arg10[%c5, %c0_52, %c0_53], %73 {strides = array<i32>} : memref<6x24x4xbf16, #tpu.memory_space<vmem>>, vector<1x16x4xbf16>,
    } else {
    }
    %c3_i32_16 = arith.constant 3 : i32
    %27 = arith.cmpi slt, %arg1, %c3_i32_16 : i32
    %28 = arith.extui %27 : i1 to i32
    %c0_i32_17 = arith.constant 0 : i32
    %29 = arith.cmpi ne, %28, %c0_i32_17 : i32
    scf.if %29 {
      %c4_i32_51 = arith.constant 4 : i32
      %73 = arith.addi %1, %c4_i32_51 : i32
      %c0_52 = arith.constant 0 : index
      %74 = arith.index_cast %73 : i32 to index
      %c0_53 = arith.constant 0 : index
      %c0_54 = arith.constant 0 : index
      %75 = vector.load %arg2[%c0_52, %74, %c0_53, %c0_54] : memref<1x16x16x16xbf16, #tpu.memory_space<vmem>>, vector<1x1x16x16xbf16>
      %76 = vector.shape_cast %75 : vector<1x1x16x16xbf16> to vector<1x16x16xbf16>
      %77 = vector.shape_cast %76 : vector<1x16x16xbf16> to vector<16x16xbf16>
      %c0_55 = arith.constant 0 : index
      %c0_56 = arith.constant 0 : index
      %78 = vector.load %arg3[%c0_55, %c0_56] : memref<16x4xbf16, #tpu.memory_space<vmem>>, vector<16x4xbf16>
      %cst_57 = arith.constant dense<0.000000e+00> : vector<16x4xf32>
      %79 = tpu.matmul %77, %78, %cst_57 {dimension_numbers = #tpu.dot_dimension_numbers<[1], [0], [0], [1], [0, 0, 1, 1], [], []>} : vector<16x16xbf16>, vector<16x4xbf16>, vector<16x4xf32> -> vector<16x4xf32>
      %c0_58 = arith.constant 0 : index
      %c0_59 = arith.constant 0 : index
      %80 = vector.load %arg4[%c0_58, %c0_59] : memref<1x4xf32, #tpu.memory_space<vmem>>, vector<1x4xf32>
      %81 = vector.broadcast %80 : vector<1x4xf32> to vector<16x4xf32>
      %82 = arith.addf %79, %81 : vector<16x4xf32>
      %cst_60 = arith.constant 0.000000e+00 : f32
      %83 = vector.broadcast %cst_60 : f32 to vector<16x4xf32>
      %84 = arith.maximumf %82, %83 : vector<16x4xf32>
      %85 = vector.shape_cast %84 : vector<16x4xf32> to vector<1x16x4xf32>
      %86 = arith.truncf %85 : vector<1x16x4xf32> to vector<1x16x4xbf16>
      %c5 = arith.constant 5 : index
      %c0_61 = arith.constant 0 : index
      %c0_62 = arith.constant 0 : index
      %87 = vector.load %arg10[%c5, %c0_61, %c0_62] : memref<6x24x4xbf16, #tpu.memory_space<vmem>>, vector<1x16x4xbf16>
      tpu.vector_store %arg10[%c5, %c0_61, %c0_62], %86 {strides = array<i32>} : memref<6x24x4xbf16, #tpu.memory_space<vmem>>, vector<1x16x4xbf16>,
    } else {
    }
    %c0_18 = arith.constant 0 : index
    %c0_19 = arith.constant 0 : index
    %c0_20 = arith.constant 0 : index
    %30 = vector.load %arg10[%c0_18, %c0_19, %c0_20] : memref<6x24x4xbf16, #tpu.memory_space<vmem>>, vector<4x24x4xbf16>
    %31 = vector.shape_cast %30 : vector<4x24x4xbf16> to vector<96x4xbf16>
    %c0_21 = arith.constant 0 : index
    %c0_22 = arith.constant 0 : index
    %c0_23 = arith.constant 0 : index
    %32 = vector.load %arg5[%c0_21, %c0_22, %c0_23] : memref<3x4x12xbf16, #tpu.memory_space<vmem>>, vector<1x4x12xbf16>
    %33 = vector.shape_cast %32 : vector<1x4x12xbf16> to vector<4x12xbf16>
    %cst_24 = arith.constant dense<0.000000e+00> : vector<96x12xf32>
    %34 = tpu.matmul %31, %33, %cst_24 {dimension_numbers = #tpu.dot_dimension_numbers<[1], [0], [0], [1], [0, 0, 1, 1], [], []>} : vector<96x4xbf16>, vector<4x12xbf16>, vector<96x12xf32> -> vector<96x12xf32>
    %c1_25 = arith.constant 1 : index
    %c0_26 = arith.constant 0 : index
    %c0_27 = arith.constant 0 : index
    %35 = vector.load %arg10[%c1_25, %c0_26, %c0_27] : memref<6x24x4xbf16, #tpu.memory_space<vmem>>, vector<4x24x4xbf16>
    %36 = vector.shape_cast %35 : vector<4x24x4xbf16> to vector<96x4xbf16>
    %c1_28 = arith.constant 1 : index
    %c0_29 = arith.constant 0 : index
    %c0_30 = arith.constant 0 : index
    %37 = vector.load %arg5[%c1_28, %c0_29, %c0_30] : memref<3x4x12xbf16, #tpu.memory_space<vmem>>, vector<1x4x12xbf16>
    %38 = vector.shape_cast %37 : vector<1x4x12xbf16> to vector<4x12xbf16>
    %cst_31 = arith.constant dense<0.000000e+00> : vector<96x12xf32>
    %39 = tpu.matmul %36, %38, %cst_31 {dimension_numbers = #tpu.dot_dimension_numbers<[1], [0], [0], [1], [0, 0, 1, 1], [], []>} : vector<96x4xbf16>, vector<4x12xbf16>, vector<96x12xf32> -> vector<96x12xf32>
    %40 = arith.addf %34, %39 : vector<96x12xf32>
    %c2 = arith.constant 2 : index
    %c0_32 = arith.constant 0 : index
    %c0_33 = arith.constant 0 : index
    %41 = vector.load %arg10[%c2, %c0_32, %c0_33] : memref<6x24x4xbf16, #tpu.memory_space<vmem>>, vector<4x24x4xbf16>
    %42 = vector.shape_cast %41 : vector<4x24x4xbf16> to vector<96x4xbf16>
    %c2_34 = arith.constant 2 : index
    %c0_35 = arith.constant 0 : index
    %c0_36 = arith.constant 0 : index
    %43 = vector.load %arg5[%c2_34, %c0_35, %c0_36] : memref<3x4x12xbf16, #tpu.memory_space<vmem>>, vector<1x4x12xbf16>
    %44 = vector.shape_cast %43 : vector<1x4x12xbf16> to vector<4x12xbf16>
    %cst_37 = arith.constant dense<0.000000e+00> : vector<96x12xf32>
    %45 = tpu.matmul %42, %44, %cst_37 {dimension_numbers = #tpu.dot_dimension_numbers<[1], [0], [0], [1], [0, 0, 1, 1], [], []>} : vector<96x4xbf16>, vector<4x12xbf16>, vector<96x12xf32> -> vector<96x12xf32>
    %46 = arith.addf %40, %45 : vector<96x12xf32>
    %47 = vector.extract_strided_slice %46 {offsets = [0, 4], sizes = [96, 4], strides = [1, 1]} : vector<96x12xf32> to vector<96x4xf32>
    %48 = vector.extract_strided_slice %46 {offsets = [0, 0], sizes = [96, 4], strides = [1, 1]} : vector<96x12xf32> to vector<96x4xf32>
    %c1_i32 = arith.constant 1 : i32
    %49 = tpu.dynamic_rotate %48 by %c1_i32 dim 0 : vector<96x4xf32>, i32 -> vector<96x4xf32>
    %50 = arith.addf %47, %49 : vector<96x4xf32>
    %51 = vector.extract_strided_slice %46 {offsets = [0, 8], sizes = [96, 4], strides = [1, 1]} : vector<96x12xf32> to vector<96x4xf32>
    %c95_i32 = arith.constant 95 : i32
    %52 = tpu.dynamic_rotate %51 by %c95_i32 dim 0 : vector<96x4xf32>, i32 -> vector<96x4xf32>
    %53 = arith.addf %50, %52 : vector<96x4xf32>
    %c0_38 = arith.constant 0 : index
    %c0_39 = arith.constant 0 : index
    %54 = vector.load %arg6[%c0_38, %c0_39] : memref<1x4xf32, #tpu.memory_space<vmem>>, vector<1x4xf32>
    %55 = vector.broadcast %54 : vector<1x4xf32> to vector<96x4xf32>
    %56 = arith.addf %53, %55 : vector<96x4xf32>
    %cst_40 = arith.constant 0.000000e+00 : f32
    %57 = vector.broadcast %cst_40 : f32 to vector<96x4xf32>
    %58 = arith.maximumf %56, %57 : vector<96x4xf32>
    %59 = arith.truncf %58 : vector<96x4xf32> to vector<96x4xbf16>
    %c0_41 = arith.constant 0 : index
    %c0_42 = arith.constant 0 : index
    %60 = vector.load %arg7[%c0_41, %c0_42] : memref<4x16xbf16, #tpu.memory_space<vmem>>, vector<4x16xbf16>
    %cst_43 = arith.constant dense<0.000000e+00> : vector<96x16xf32>
    %61 = tpu.matmul %59, %60, %cst_43 {dimension_numbers = #tpu.dot_dimension_numbers<[1], [0], [0], [1], [0, 0, 1, 1], [], []>} : vector<96x4xbf16>, vector<4x16xbf16>, vector<96x16xf32> -> vector<96x16xf32>
    %c0_44 = arith.constant 0 : index
    %c0_45 = arith.constant 0 : index
    %62 = vector.load %arg8[%c0_44, %c0_45] : memref<1x16xf32, #tpu.memory_space<vmem>>, vector<1x16xf32>
    %63 = vector.broadcast %62 : vector<1x16xf32> to vector<96x16xf32>
    %64 = arith.addf %61, %63 : vector<96x16xf32>
    %65 = vector.shape_cast %64 : vector<96x16xf32> to vector<4x24x16xf32>
    %66 = vector.extract_strided_slice %65 {offsets = [0, 0, 0], sizes = [4, 16, 16], strides = [1, 1, 1]} : vector<4x24x16xf32> to vector<4x16x16xf32>
    %67 = arith.extf %6 : vector<4x16x16xbf16> to vector<4x16x16xf32>
    %68 = arith.addf %66, %67 : vector<4x16x16xf32>
    %cst_46 = arith.constant 0.000000e+00 : f32
    %69 = vector.broadcast %cst_46 : f32 to vector<4x16x16xf32>
    %70 = arith.maximumf %68, %69 : vector<4x16x16xf32>
    %71 = vector.shape_cast %70 : vector<4x16x16xf32> to vector<1x4x16x16xf32>
    %c0_47 = arith.constant 0 : index
    %c0_48 = arith.constant 0 : index
    %c0_49 = arith.constant 0 : index
    %c0_50 = arith.constant 0 : index
    %72 = vector.load %arg9[%c0_47, %c0_48, %c0_49, %c0_50] : memref<1x4x16x16xf32, #tpu.memory_space<vmem>>, vector<1x4x16x16xf32>
    tpu.vector_store %arg9[%c0_47, %c0_48, %c0_49, %c0_50], %71 {strides = array<i32>} : memref<1x4x16x16xf32, #tpu.memory_space<vmem>>, vector<1x4x16x16xf32>,
    return
  }
  func.func @transform_0(%arg0: i32, %arg1: i32) -> (i32, i32, i32, i32) {
    %c0_i32 = arith.constant 0 : i32
    %c0_i32_0 = arith.constant 0 : i32
    %c0_i32_1 = arith.constant 0 : i32
    %c0_i32_2 = arith.constant 0 : i32
    return %arg0, %c0_i32, %c0_i32_0, %c0_i32_1 : i32, i32, i32, i32
  }
  func.func @transform_1(%arg0: i32, %arg1: i32) -> (i32, i32) {
    %c0_i32 = arith.constant 0 : i32
    %c0_i32_0 = arith.constant 0 : i32
    %c0_i32_1 = arith.constant 0 : i32
    return %c0_i32, %c0_i32_0 : i32, i32
  }
  func.func @transform_2(%arg0: i32, %arg1: i32) -> (i32, i32) {
    %c0_i32 = arith.constant 0 : i32
    %c0_i32_0 = arith.constant 0 : i32
    %c0_i32_1 = arith.constant 0 : i32
    return %c0_i32, %c0_i32_0 : i32, i32
  }
  func.func @transform_3(%arg0: i32, %arg1: i32) -> (i32, i32, i32) {
    %c0_i32 = arith.constant 0 : i32
    %c0_i32_0 = arith.constant 0 : i32
    %c0_i32_1 = arith.constant 0 : i32
    %c0_i32_2 = arith.constant 0 : i32
    return %c0_i32, %c0_i32_0, %c0_i32_1 : i32, i32, i32
  }
  func.func @transform_4(%arg0: i32, %arg1: i32) -> (i32, i32) {
    %c0_i32 = arith.constant 0 : i32
    %c0_i32_0 = arith.constant 0 : i32
    %c0_i32_1 = arith.constant 0 : i32
    return %c0_i32, %c0_i32_0 : i32, i32
  }
  func.func @transform_5(%arg0: i32, %arg1: i32) -> (i32, i32) {
    %c0_i32 = arith.constant 0 : i32
    %c0_i32_0 = arith.constant 0 : i32
    %c0_i32_1 = arith.constant 0 : i32
    return %c0_i32, %c0_i32_0 : i32, i32
  }
  func.func @transform_6(%arg0: i32, %arg1: i32) -> (i32, i32) {
    %c0_i32 = arith.constant 0 : i32
    %c0_i32_0 = arith.constant 0 : i32
    %c0_i32_1 = arith.constant 0 : i32
    return %c0_i32, %c0_i32_0 : i32, i32
  }
  func.func @transform_7(%arg0: i32, %arg1: i32) -> (i32, i32, i32, i32) {
    %c0_i32 = arith.constant 0 : i32
    %c0_i32_0 = arith.constant 0 : i32
    %c0_i32_1 = arith.constant 0 : i32
    return %arg0, %arg1, %c0_i32, %c0_i32_0 : i32, i32, i32, i32
  }
}

</mosaic_0001>

<bundles_post_ra>
// kernel: tpu_custom_call.1
= control target key start
LH: loop header
LB: loop body
LE: loop exit
PB: predicated region body
PF: predicated region fallthrough
CT: control target
= control target key end

     0   :  { %s2388_s0 = inlined_call_operand.hbm [shape: bf16[2,16,16,16], index: 0, kind: input, shape index: {}]   ;;  %s2389_s1 = inlined_call_operand.vmem [shape: bf16[16,4], index: 1, kind: input, shape index: {}]   ;;  %s2390_s2 = inlined_call_operand.vmem [shape: f32[1,4], index: 2, kind: input, shape index: {}]   ;;  %s2391_s3 = inlined_call_operand.vmem [shape: bf16[3,4,12], index: 3, kind: input, shape index: {}]   ;;  %s2392_s4 = inlined_call_operand.vmem [shape: f32[1,4], index: 4, kind: input, shape index: {}]   ;;  %s2393_s5 = inlined_call_operand.vmem [shape: bf16[4,16], index: 5, kind: input, shape index: {}]   ;;  %s2394_s6 = inlined_call_operand.vmem [shape: f32[1,16], index: 6, kind: input, shape index: {}]   ;;  %s2395_s7 = inlined_call_operand.hbm [shape: f32[2,16,16,16], index: 7, kind: output, shape index: {}]  }
   0x1   :  { %2403 = sst [smem:[#allocation16_spill]] %s2395_s7 }
   0x2   :  { %12 = vsyncpa [#allocation4], 0 }
   0x3   :  { %14 = vsyncpa [#allocation4 + $0x1], 0 }
   0x4   :  { %15 = vsyncpa [#allocation5], 0 }
   0x5   :  { %17 = vsyncpa [#allocation5 + $0x1], 0  ;;  %s1882_s24 = smov 0   ;;  %s1884_s25 = smov 0  }
   0x6   :  { %s1886_s26 = smov 0   ;;  %s1888_s27 = smov 0  }
   0x7   :  { %s1890_s28 = smov 0   ;;  %s1892_s29 = smov 0  }
   0x8   :  { %s1894_s30 = smov 0   ;;  %s1896_s8 = smov 0  }
   0x9   :  { %s1898_s9 = smov 0   ;;  %s1900_s10 = smov 0  }
   0xa   :  { %s1902_s11 = smov 0  }
   0xb LB: > { %2404 = sst [smem:[#allocation9_spill]] %s1822_s9  ;;  %s1354_s12 = sadd.s32 4294967295, %s1830_s11   ;;  %s1830_s11 = sphi %s1902_s11, %s23_s11   ;;  %s1826_s10 = sphi %s1900_s10, %s2422_s10   ;;  %s1822_s9 = sphi %s1898_s9, %s2421_s9   ;;  %s1818_s8 = sphi %s1896_s8, %s2420_s8   ;;  %s1814_s30 = sphi %s1894_s30, %s2419_s30   ;;  %s1810_s29 = sphi %s1892_s29, %s2428_s29   ;;  %s1806_s28 = sphi %s1890_s28, %s2427_s28   ;;  %s1802_s27 = sphi %s1888_s27, %s2426_s27   ;;  %s1798_s26 = sphi %s1886_s26, %s2425_s26   ;;  %s1794_s25 = sphi %s1884_s25, %s2424_s25   ;;  %s1790_s24 = sphi %s1882_s24, %s2423_s24  }
   0xc   : > { %2405 = sst [smem:[#allocation10_spill]] %s1826_s10  ;;  %s1355_s13 = sadd.s32 4294967294, %s1830_s11  }
   0xd   : > { %s32_s14 = sadd.s32 1, %s1822_s9  ;;  %s35_s15 = sadd.s32 1, %s1826_s10 }
   0xe   : > { %p33_p0 = scmp.ge.s32.totalorder %s32_s14, 4  ;;  %s42_s16 = sadd.s32 1, %s1810_s29 }
   0xf   : > { %p49_p1 = scmp.ne.s32.totalorder %s1810_s29, %s1806_s28  ;;  %p50_p2 = scmp.eq.s32.totalorder %s1830_s11, 0 }
  0x10   : > { %s2430_s14 = smov (%p33_p0, %s32_s14), 0  ;;  %s2432_s15 = smov (!%p33_p0, %s35_s15), %s1826_s10 }
  0x11   : > { %2406 = sst [smem:[#allocation11_spill]] %s2430_s14  ;;  %p1946_p3 = por %p50_p2, %p49_p1 }
  0x12   : > { %p55_p4 = scmp.ne.s32.totalorder %s1806_s28, %s1802_s27  ;;  %p37_p5 = scmp.ge.s32.totalorder %s2432_s15, 2 }
  0x13   : > { %p56_p6 = scmp.eq.s32.totalorder %s1354_s12, 0  ;;  %s192_s18 = ssub.s32 %s1822_s9, %s2430_s14 }
  0x14   : > { %s196_s19 = sadd.s32 1, %s1798_s26  ;;  %s2434_s15 = smov (%p37_p5, %s2432_s15), 0 }
  0x15   : > { %2408 = sst [smem:[#allocation12_spill]] %s2434_s15  ;;  %p1956_p7 = por %p56_p6, %p55_p4 }
  0x16   : > { %p206_p8 = scmp.ne.s32.totalorder %s1798_s26, %s1794_s25  ;;  %s39_s21 = ssub.s32 %s1826_s10, %s2434_s15 }
  0x17   : > { %p207_p9 = scmp.eq.s32.totalorder %s1354_s12, 7  ;;  %p40_p10 = scmp.eq.s32.totalorder %s39_s21, 0 }
  0x18   : > { %s193_s22 = sor.u32 %s192_s18, %s39_s21  ;;  %p212_p13 = scmp.ne.s32.totalorder %s1794_s25, %s1790_s24 }
  0x19   : > { %p194_p11 = scmp.eq.s32.totalorder %s193_s22, 0  ;;  %p1964_p12 = por %p207_p9, %p206_p8 }
  0x1a   : > { %s1969_s27 = scalar_select %p40_p10, %s1810_s29, %s42_s16  }
  0x1b   : > { %s2410_s23 = scalar_select %p1964_p12, 1, 0 }
  0x1c   : > { %2412 = sst [smem:[#allocation14_spill]] %s1969_s27  ;;  %p213_p0 = scmp.eq.s32.totalorder %s1355_s13, 7 }
  0x1d   : > { %2411 = sst [smem:[#allocation13_spill]] %s2410_s23  ;;  %p1573_p1 = scmp.lt.s32.totalorder %s1830_s11, 8 }
  0x1e   : > { %s1972_s14 = scalar_select %p194_p11, %s1798_s26, %s196_s19  }
  0x1f   : > { %p1977_p2 = por %p213_p0, %p212_p13  ;;  %s251_s12 = sand.u32 1, %s1810_s29  }
  0x20   : > { %2413 = sst [smem:[#allocation15_spill]] %s1972_s14  ;;  %s1358_s18 = sshll.u32 %s251_s12, 7 }
  0x21   : > { %s1525_s21 = sshll.u32 %s1826_s10, 7  ;;  %s255_s16 = scalar_lea.vmem [#allocation3], %s1358_s18 }
  0x22   : > { %s260_s23 = scalar_lea.hbm %s2388_s0, %s1525_s21  ;;  %s263_s27 = sshll.u32 %s255_s16, 4  ;;  %s264_s27 = int_to_ptr.vmem [resolvable:$true] %s263_s27 }
  0x23   : > { %s261_s7 = sshll.u32 %s260_s23, 4  ;;  %p1566_p4 = pnand %p1573_p1, %p1946_p3  ;;  %s262_s7 = int_to_ptr.hbm [resolvable:$true] %s261_s7 }
  0x24   : > { %p1361_p5 = scmp.ge.s32.totalorder %s1830_s11, 1  ;;  %s252_s13 = scalar_lea.sflag [#allocation4], %s251_s12 }
  0x25   : > { %s1832_s19 = smov 64   ;;  %s1833_s14 = smov 4  }
  0x26   : > { %1568 = dma.hbm_to_vmem [thread:$0]  (!%p1566_p4), %s262_s7, 2048, %s264_s27, %s252_s13, %s1832_s19, %s1832_s19, %s1833_s14  }
  0x27   : > { %p271_p6 = scmp.lt.s32.totalorder %s1830_s11, 9 }
  0x29   : > { %p272_p8 = pnand %p1361_p5, %p271_p6 }
  0x2a   : > { %s277_s10 = sand.u32 (!%p272_p8), 1, %s1806_s28  }
  0x2b   : > { %275 = sbr.rel (%p272_p8) target bundleno = 1330 (0x532), region = 48  ;;  %s1991_s15 = sshll.u32 (!%p272_p8), %s277_s10, 7 }
  0x2c   : > { %s278_s18 = scalar_lea.sflag (!%p272_p8), [#allocation4], %s277_s10  ;;  %s281_s23 = scalar_lea.vmem (!%p272_p8), [#allocation3], %s1991_s15 }
  0x30   : > { %1781 = dma.done.wait (%p1956_p7), %s278_s18, 2048  }
  0x31   : > { %1783 = vsyncadd (%p1956_p7), %s278_s18, 4294965248  ;;  %s310_s7 = sand.u32 1, %s1794_s25   ;;  %s1364_s14 = sshll.u32 %s1814_s30, 2  ;;  %vm316_vm0 = vcmask 27648   ;;  %v1834_v0 = vmov 0   ;;  %v1532_v1 = vld [vmem:[%s2389_s1] sm:$0xff] }
  0x32   : > { %s2002_s17 = sshll.u32 %s310_s7, 6  ;;  %s1527_s27 = sshll.u32 %s1814_s30, 5  ;;  %317 = vst.msk [vmem:[#allocation2 + $0x8] sm:$0xf] %vm316_vm0, %v1834_v0  ;;  %386 = vmatpush.bf16.msra.mxu0 %v1532_v1  ;;  %1558 = vmatpush.bf16.msra.mxu1 %v1532_v1  ;;  %vm366_vm1 = vcmask 130048  }
  0x33   : > { %318 = vst.msk [vmem:[#allocation2 + $0x14] sm:$0xf] %vm316_vm0, %v1834_v0  ;;  %s2010_s10 = scalar_lea.vmem %s281_s23, %s1527_s27 [#allocation3]  ;;  %1559 = vmatpush.bf16.msra.mxu2 %v1532_v1  ;;  %1560 = vmatpush.bf16.msra.mxu3 %v1532_v1  ;;  %v1673_v10 = vld [vmem:[%s2390_s2] ss:$0 sm:$0xff]  ;;  %s2050_s16 = scalar_lea.vmem [#allocation6], %s2002_s17 }
  0x34   : > { %319 = vst.msk [vmem:[#allocation2 + $0x20] sm:$0xf] %vm316_vm0, %v1834_v0  ;;  %v2019_v2 = vld [vmem:[%s2010_s10] sm:$0xff]   ;;  %v2023_v4 = vld [vmem:[%s2010_s10 + $0x8] sm:$0xff]   ;;  %v2026_v5 = vld [vmem:[%s2010_s10 + $0x10] sm:$0xff]   ;;  %p1391_p3 = scmp.ne.s32.totalorder %s1814_s30, 0 }
  0x35   : > { %320 = vst.msk [vmem:[#allocation2 + $0x2c] sm:$0xf] %vm316_vm0, %v1834_v0  ;;  %v1528_v3 = vld [vmem:[%s2010_s10] sm:$0xff]  ;;  %v2029_v6 = vld [vmem:[%s2010_s10 + $0x18] sm:$0xff]   ;;  %v1529_v7 = vld [vmem:[%s2010_s10 + $0x8] sm:$0xff] }
  0x36   : > { %321 = vst.msk [vmem:[#allocation2 + $0x38] sm:$0xf] %vm316_vm0, %v1834_v0  ;;  %v1530_v8 = vld [vmem:[%s2010_s10 + $0x10] sm:$0xff]  ;;  %v1531_v9 = vld [vmem:[%s2010_s10 + $0x18] sm:$0xff]  ;;  %1387 = vmatmul.msk.bf16.vlgmr.msra.gmra.mxu0 %vm366_vm1, %v1528_v3  ;;  %1388 = vmatmul.msk.bf16.vlgmr.msra.gmra.mxu1 %vm366_vm1, %v1529_v7 }
  0x37   : > { %322 = vst.msk [vmem:[#allocation2 + $0x44] sm:$0xf] %vm316_vm0, %v1834_v0  ;;  %1389 = vmatmul.msk.bf16.vlgmr.msra.gmra.mxu2 %vm366_vm1, %v1530_v8  ;;  %1390 = vmatmul.msk.bf16.vlgmr.msra.gmra.mxu3 %vm366_vm1, %v1531_v9 }
  0xb3   : > { %v388_v11 = vpop.f32.mrf.mxu0  ;;  %v393_v12 = vpop.f32.mrf.mxu1 }
  0xb4   : > { %v389_v13 = vadd.f32 %v1673_v10, %v388_v11  ;;  %v394_v14 = vadd.f32 %v1673_v10, %v393_v12 }
  0xb6   : > { %v408_v15 = vmax.f32 %v389_v13, 0.0  ;;  %v410_v16 = vmax.f32 %v394_v14, 0.0 }
  0xb8   : > { %v416_v17 = vpack.c.bf16 %v408_v15, %v408_v15  ;;  %v418_v18 = vpack.c.bf16 %v410_v16, %v410_v16 }
  0xba   : > { %425 = vst.msk [vmem:[#allocation2 + $0xc] sm:$0xf] %vm316_vm0, %v416_v17  ;;  %v398_v19 = vpop.f32.mrf.mxu2  ;;  %v403_v20 = vpop.f32.mrf.mxu3 }
  0xbb   : > { %427 = vst.msk [vmem:[#allocation2 + $0x18] sm:$0xf] %vm316_vm0, %v418_v18  ;;  %v399_v21 = vadd.f32 %v1673_v10, %v398_v19  ;;  %v404_v22 = vadd.f32 %v1673_v10, %v403_v20  ;;  %v390_v23 = vpop.f32.mrf.mxu0  ;;  %v395_v24 = vpop.f32.mrf.mxu1 }
  0xbc   : > { %v391_v25 = vadd.f32 %v1673_v10, %v390_v23  ;;  %v396_v26 = vadd.f32 %v1673_v10, %v395_v24 }
  0xbd   : > { %v412_v27 = vmax.f32 %v399_v21, 0.0  ;;  %v414_v28 = vmax.f32 %v404_v22, 0.0 }
  0xbe   : > { %v409_v29 = vmax.f32 %v391_v25, 0.0  ;;  %v411_v30 = vmax.f32 %v396_v26, 0.0 }
  0xbf   : > { %v420_v31 = vpack.c.bf16 %v412_v27, %v412_v27  ;;  %v422_v32 = vpack.c.bf16 %v414_v28, %v414_v28 }
  0xc0   : > { %v417_v33 = vpack.c.bf16 %v409_v29, %v409_v29  ;;  %v419_v34 = vpack.c.bf16 %v411_v30, %v411_v30 }
  0xc1   : > { %429 = vst.msk [vmem:[#allocation2 + $0x24] sm:$0xf] %vm316_vm0, %v420_v31 }
  0xc2   : > { %431 = vst.msk [vmem:[#allocation2 + $0x30] sm:$0xf] %vm316_vm0, %v422_v32  ;;  %v400_v35 = vpop.f32.mrf.mxu2  ;;  %v405_v36 = vpop.f32.mrf.mxu3 }
  0xc3   : > { %426 = vst.msk [vmem:[#allocation2 + $0x10] sm:$0xf] %vm316_vm0, %v417_v33  ;;  %v401_v37 = vadd.f32 %v1673_v10, %v400_v35  ;;  %v406_v38 = vadd.f32 %v1673_v10, %v405_v36 }
  0xc4   : > { %428 = vst.msk [vmem:[#allocation2 + $0x1c] sm:$0xf] %vm316_vm0, %v419_v34 }
  0xc5   : > { %v413_v39 = vmax.f32 %v401_v37, 0.0  ;;  %v415_v40 = vmax.f32 %v406_v38, 0.0 }
  0xc6   : > { %436 = sbr.rel (%p1391_p3) target bundleno = 206 (0xce), region = 56 }
  0xc7   : > { %v421_v41 = vpack.c.bf16 %v413_v39, %v413_v39  ;;  %v423_v42 = vpack.c.bf16 %v415_v40, %v415_v40 }
  0xc9   : > { %430 = vst.msk [vmem:[#allocation2 + $0x28] sm:$0xf] %vm316_vm0, %v421_v41 }
  0xca   : > { %432 = vst.msk [vmem:[#allocation2 + $0x34] sm:$0xf] %vm316_vm0, %v423_v42 }
  0xcb   : > { %v1835_v43 = vmov 0  }
  0xcc   : > { %437 = vst.msk [vmem:[#allocation2] sm:$0xf] %vm316_vm0, %v1835_v43 }
  0xcd   : > { %438 = vst.msk [vmem:[#allocation2 + $0x4] sm:$0xf] %vm316_vm0, %v1835_v43 }
  0xce PF: > { %p1392_p7 = scmp.le.s32.totalorder %s1814_s30, 0 }
  0xcf   : > { %s1393_s18 = sadd.s32 (!%p1392_p7), 4294967295, %s1364_s14 }
  0xd0   : > { %442 = sbr.rel (%p1392_p7) target bundleno = 358 (0x166), region = 60  ;;  %s1533_s17 = sshll.u32 (!%p1392_p7), %s1393_s18, 3 }
  0xd1   : > { %s446_s27 = scalar_lea.vmem (!%p1392_p7), %s281_s23, %s1533_s17 [#allocation3] }
  0xd5   : > { %v1535_v44 = vld [vmem:[%s2389_s1] sm:$0xff] }
  0xd6   : > { %476 = vmatpush.bf16.msra.mxu0 %v1535_v44  ;;  %v1534_v45 = vld [vmem:[%s446_s27] sm:$0xff] }
  0xd7   : > { %v1674_v46 = vld [vmem:[%s2390_s2] ss:$0 sm:$0xff] }
  0xd9   : > { %1404 = vmatmul.msk.bf16.vlgmr.msra.gmra.mxu0 %vm366_vm1, %v1534_v45 }
 0x156   : > { %v478_v47 = vpop.f32.mrf.mxu0 }
 0x157   : > { %v479_v48 = vadd.f32 %v1674_v46, %v478_v47 }
 0x159   : > { %v483_v49 = vmax.f32 %v479_v48, 0.0 }
 0x15b   : > { %v485_v50 = vpack.c.bf16 %v483_v49, %v483_v49 }
 0x15d   : > { %487 = vst.msk [vmem:[#allocation2] sm:$0xf] %vm316_vm0, %v485_v50 }
 0x15e   : > { %v480_v51 = vpop.f32.mrf.mxu0 }
 0x15f   : > { %v481_v52 = vadd.f32 %v1674_v46, %v480_v51 }
 0x161   : > { %v484_v53 = vmax.f32 %v481_v52, 0.0 }
 0x163   : > { %v486_v54 = vpack.c.bf16 %v484_v53, %v484_v53 }
 0x165   : > { %488 = vst.msk [vmem:[#allocation2 + $0x4] sm:$0xf] %vm316_vm0, %v486_v54 }
 0x166 PF: > { %p1405_p9 = scmp.ne.s32.totalorder %s1814_s30, 3 }
 0x168   : > { %492 = sbr.rel (%p1405_p9) target bundleno = 368 (0x170), region = 64 }
 0x16d   : > { %v1836_v55 = vmov 0  }
 0x16e   : > { %494 = vst.msk [vmem:[#allocation2 + $0x3c] sm:$0xf] %vm316_vm0, %v1836_v55 }
 0x16f   : > { %495 = vst.msk [vmem:[#allocation2 + $0x40] sm:$0xf] %vm316_vm0, %v1836_v55 }
 0x170 PF: > { %p1406_p10 = scmp.ge.s32.totalorder %s1814_s30, 3 }
 0x172   : > { %499 = sbr.rel (%p1406_p10) target bundleno = 520 (0x208), region = 68 }
 0x177   : > { %v1538_v56 = vld [vmem:[%s2389_s1] sm:$0xff] }
 0x178   : > { %v1537_v57 = vld [vmem:[%s2010_s10 + $0x20] sm:$0xff]  ;;  %533 = vmatpush.bf16.msra.mxu0 %v1538_v56 }
 0x179   : > { %v1675_v58 = vld [vmem:[%s2390_s2] ss:$0 sm:$0xff] }
 0x17b   : > { %1419 = vmatmul.msk.bf16.vlgmr.msra.gmra.mxu0 %vm366_vm1, %v1537_v57 }
 0x1f8   : > { %v535_v59 = vpop.f32.mrf.mxu0 }
 0x1f9   : > { %v536_v60 = vadd.f32 %v1675_v58, %v535_v59 }
 0x1fb   : > { %v540_v61 = vmax.f32 %v536_v60, 0.0 }
 0x1fd   : > { %v542_v62 = vpack.c.bf16 %v540_v61, %v540_v61 }
 0x1ff   : > { %545 = vst.msk [vmem:[#allocation2 + $0x3c] sm:$0xf] %vm316_vm0, %v542_v62 }
 0x200   : > { %v537_v63 = vpop.f32.mrf.mxu0 }
 0x201   : > { %v538_v0 = vadd.f32 %v1675_v58, %v537_v63 }
 0x203   : > { %v541_v1 = vmax.f32 %v538_v0, 0.0 }
 0x205   : > { %v543_v3 = vpack.c.bf16 %v541_v1, %v541_v1 }
 0x207   : > { %546 = vst.msk [vmem:[#allocation2 + $0x40] sm:$0xf] %vm316_vm0, %v543_v3 }
 0x208 PF: > { %v1420_v7 = vld [vmem:[%s2391_s3 + $0x2] sm:$0x3]  ;;  %vm623_vm2 = vcmask 1041408   ;;  %v559_v8 = vld [vmem:[%s2391_s3] sm:$0x3]  ;;  %v1545_v12 = vld [vmem:[#allocation2 + $0xc] sm:$0xff]  ;;  %v885_v59 = vlaneseq }
 0x209   : > { %v625_v9 = vsel %vm623_vm2, %v1420_v7, 0  ;;  %v715_v10 = vsel %vm623_vm2, %v559_v8, 0  ;;  %v1481_v11 = vld [vmem:[%s2391_s3 + $0x4] sm:$0x3]  ;;  %vm604_vm3 = vcmask 31744   ;;  %v1551_v15 = vld [vmem:[#allocation2 + $0x18] sm:$0xff] }
 0x20a   : > { %v1539_v13 = vld [vmem:[#allocation2] sm:$0xff]  ;;  %634 = vmatpush.bf16.msra.mxu0 %v625_v9  ;;  %724 = vmatpush.bf16.msra.mxu1 %v715_v10  ;;  %v820_v14 = vsel %vm623_vm2, %v1481_v11, 0  ;;  %v1546_v16 = vld [vmem:[#allocation2 + $0x14] sm:$0xff]  ;;  %v1540_v17 = vld [vmem:[#allocation2 + $0x8] sm:$0xff]  ;;  %s1837_s27 = smov 120   ;;  %v2137_v0 = vshrl.u32 %v885_v59, 7 }
 0x20b   : > { %829 = vmatpush.bf16.msra.mxu2 %v820_v14  ;;  %v1552_v18 = vld [vmem:[#allocation2 + $0x20] sm:$0xff]  ;;  %v1541_v20 = vld [vmem:[#allocation2 + $0x10] sm:$0xff]  ;;  %v1553_v21 = vld [vmem:[#allocation2 + $0x28] sm:$0xff]  ;;  %s1838_s20 = smov 4   ;;  %s1839_s23 = smov 124  }
 0x20c   : > { %v1547_v19 = vld [vmem:[#allocation2 + $0x1c] sm:$0xff]  ;;  %v1548_v22 = vld [vmem:[#allocation2 + $0x24] sm:$0xff]  ;;  %v1554_v24 = vld [vmem:[#allocation2 + $0x30] sm:$0xff]  ;;  %vm887_vm4 = vcmp.lt.s32.totalorder %v2137_v0, 1  ;;  %vm1020_vm5 = vcmp.lt.s32.totalorder %v2137_v0, 7  ;;  %s1557_s13 = sshll.u32 %s1814_s30, 3 }
 0x20d   : > { %1445 = vmatmul.msk.bf16.vlgmr.msra.gmra.mxu0 %vm604_vm3, %v1545_v12  ;;  %1475 = vmatmul.msk.bf16.vlgmr.msra.gmra.mxu1 %vm604_vm3, %v1539_v13  ;;  %v1542_v23 = vld [vmem:[#allocation2 + $0x18] sm:$0xff]  ;;  %v1549_v25 = vld [vmem:[#allocation2 + $0x2c] sm:$0xff]  ;;  %v1543_v26 = vld [vmem:[#allocation2 + $0x20] sm:$0xff]  ;;  %s1521_s19 = sshll.u32 %s1818_s8, 5  ;;  %s2415_s12 = sld [smem:[#allocation16_spill]] }
 0x20e   : > { %1506 = vmatmul.msk.bf16.vlgmr.msra.gmra.mxu2 %vm604_vm3, %v1551_v15  ;;  %v1555_v27 = vld [vmem:[#allocation2 + $0x38] sm:$0xff]  ;;  %v1544_v29 = vld [vmem:[#allocation2 + $0x28] sm:$0xff]  ;;  %v1556_v30 = vld [vmem:[#allocation2 + $0x40] sm:$0xff]  ;;  %s1253_s18 = sadd.s32 %s1557_s13, %s1521_s19  ;;  %s1256_s14 = sshll.u32 %s2050_s16, 4  ;;  %s1257_s14 = int_to_ptr.vmem [resolvable:$true] %s1256_s14 }
 0x20f   : > { %v1550_v28 = vld [vmem:[#allocation2 + $0x34] sm:$0xff]  ;;  %v1676_v14 = vld [vmem:[%s2392_s4] ss:$0 sm:$0xff]  ;;  %s1522_s17 = sshll.u32 %s1253_s18, 3  ;;  %s1241_s8 = scalar_lea.sflag [#allocation5], %s310_s7 }
 0x213   : > { %s1255_s15 = scalar_lea.hbm %s2415_s12, %s1522_s17  ;;  %s1728_s19 = scalar_lea.hbm %s2415_s12, 512 }
 0x214   : > { %s1258_s30 = sshll.u32 %s1255_s15, 4  ;;  %s1259_s30 = int_to_ptr.hbm [resolvable:$true] %s1258_s30 }
 0x215   : > { %s1722_s21 = sshra.s32 %s1259_s30, 4  ;;  %s1723_s21 = int_to_ptr.hbm [resolvable:$true] %s1722_s21 }
 0x216   : > { %s1724_s10 = scalar_lea.hbm %s1723_s21, 64  ;;  %p1729_p1 = scmp.lt.s32.totalorder %s1723_s21, %s2415_s12 }
 0x217   : > { %p1725_p11 = scmp.ne.s32.totalorder %s1723_s21, %s1724_s10  ;;  %p1730_p4 = scmp.lt.s32.totalorder %s1728_s19, %s1724_s10 }
 0x219   : > { %p1726_p13 = pnand %p1725_p11, %p1964_p12  ;;  %p1731_p5 = por %p1730_p4, %p1729_p1 }
 0x21b   : > { %p1727_p0 = pneg %p1726_p13 }
 0x21d   : > { %1446 = vmatmul.msk.bf16.gmra.mxu0 %vm604_vm3, %v1546_v16  ;;  %1476 = vmatmul.msk.bf16.gmra.mxu1 %vm604_vm3, %v1540_v17  ;;  %p1732_p6 = pnand %p1731_p5, %p1727_p0 }
 0x21e   : > { %1507 = vmatmul.msk.bf16.gmra.mxu2 %vm604_vm3, %v1552_v18 }
 0x22d   : > { %1447 = vmatmul.msk.bf16.gmra.mxu0 %vm604_vm3, %v1547_v19  ;;  %1477 = vmatmul.msk.bf16.gmra.mxu1 %vm604_vm3, %v1541_v20 }
 0x22e   : > { %1508 = vmatmul.msk.bf16.gmra.mxu2 %vm604_vm3, %v1553_v21 }
 0x23d   : > { %1448 = vmatmul.msk.bf16.gmra.mxu0 %vm604_vm3, %v1548_v22  ;;  %1478 = vmatmul.msk.bf16.gmra.mxu1 %vm604_vm3, %v1542_v23 }
 0x23e   : > { %1509 = vmatmul.msk.bf16.gmra.mxu2 %vm604_vm3, %v1554_v24 }
 0x24d   : > { %1449 = vmatmul.msk.bf16.gmra.mxu0 %vm604_vm3, %v1549_v25  ;;  %1479 = vmatmul.msk.bf16.gmra.mxu1 %vm604_vm3, %v1543_v26 }
 0x24e   : > { %1510 = vmatmul.msk.bf16.gmra.mxu2 %vm604_vm3, %v1555_v27 }
 0x25d   : > { %1450 = vmatmul.msk.bf16.gmra.mxu0 %vm604_vm3, %v1550_v28  ;;  %1480 = vmatmul.msk.bf16.gmra.mxu1 %vm604_vm3, %v1544_v29 }
 0x25e   : > { %1511 = vmatmul.msk.bf16.gmra.mxu2 %vm604_vm3, %v1556_v30 }
 0x28a   : > { %v636_v31 = vpop.f32.mrf.mxu0  ;;  %v726_v32 = vpop.f32.mrf.mxu1 }
 0x28b   : > { %v727_v33 = vadd.f32 %v726_v32, %v636_v31 }
 0x291   : > { %v831_v34 = vpop.f32.mrf.mxu2 }
 0x292   : > { %v2113_v35 = vadd.f32 %v831_v34, %v727_v33  ;;  %v638_v36 = vpop.f32.mrf.mxu0  ;;  %v728_v37 = vpop.f32.mrf.mxu1 }
 0x293   : > { %v729_v38 = vadd.f32 %v728_v37, %v638_v36 }
 0x294   : > { %972 = vrot.lane.b32.xlu0 %v2113_v35, %s1837_s27  ;;  %v873_v7 = vrot.slane %v2113_v35, 7 }
 0x299   : > { %v833_v39 = vpop.f32.mrf.mxu2 }
 0x29a   : > { %v2117_v40 = vadd.f32 %v833_v39, %v729_v38  ;;  %v641_v41 = vpop.f32.mrf.mxu0  ;;  %v731_v42 = vpop.f32.mrf.mxu1 }
 0x29b   : > { %v732_v43 = vadd.f32 %v731_v42, %v641_v41 }
 0x29c   : > { %974 = vrot.lane.b32.xlu0 %v2117_v40, %s1837_s27  ;;  %v874_v3 = vrot.slane %v2117_v40, 7 }
 0x29e   : > { %v898_v12 = vsel %vm887_vm4, %v873_v7, %v874_v3 }
 0x2a1   : > { %v836_v44 = vpop.f32.mrf.mxu2 }
 0x2a2   : > { %v2121_v45 = vadd.f32 %v836_v44, %v732_v43  ;;  %v643_v46 = vpop.f32.mrf.mxu0  ;;  %v733_v47 = vpop.f32.mrf.mxu1 }
 0x2a3   : > { %v734_v48 = vadd.f32 %v733_v47, %v643_v46 }
 0x2a4   : > { %976 = vrot.lane.b32.xlu1 %v2121_v45, %s1837_s27  ;;  %v875_v20 = vrot.slane %v2121_v45, 7 }
 0x2a6   : > { %v897_v25 = vsel %vm887_vm4, %v874_v3, %v875_v20 }
 0x2a9   : > { %v838_v49 = vpop.f32.mrf.mxu2 }
 0x2aa   : > { %v2125_v50 = vadd.f32 %v838_v49, %v734_v48  ;;  %v646_v51 = vpop.f32.mrf.mxu0  ;;  %v736_v52 = vpop.f32.mrf.mxu1 }
 0x2ab   : > { %v737_v53 = vadd.f32 %v736_v52, %v646_v51 }
 0x2ac   : > { %978 = vrot.lane.b32.xlu1 %v2125_v50, %s1837_s27 }
 0x2b1   : > { %v841_v54 = vpop.f32.mrf.mxu2 }
 0x2b2   : > { %v2129_v55 = vadd.f32 %v841_v54, %v737_v53  ;;  %v648_v56 = vpop.f32.mrf.mxu0  ;;  %v738_v57 = vpop.f32.mrf.mxu1  ;;  %v876_v54 = vrot.slane %v2125_v50, 7 }
 0x2b3   : > { %v739_v58 = vadd.f32 %v738_v57, %v648_v56 }
 0x2b4   : > { %980 = vrot.lane.b32.xlu2 %v2129_v55, %s1837_s27  ;;  %v896_v59 = vsel %vm887_vm4, %v875_v20, %v876_v54 }
 0x2b9   : > { %v843_v60 = vpop.f32.mrf.mxu2 }
 0x2ba   : > { %v2133_v61 = vadd.f32 %v843_v60, %v739_v58  ;;  %v651_v62 = vpop.f32.mrf.mxu0  ;;  %v741_v63 = vpop.f32.mrf.mxu1 }
 0x2bb   : > { %v742_v1 = vadd.f32 %v741_v63, %v651_v62  ;;  %v877_v62 = vrot.slane %v2129_v55, 7 }
 0x2bc   : > { %982 = vrot.lane.b32.xlu2 %v2133_v61, %s1837_s27  ;;  %v878_v3 = vrot.slane %v2133_v61, 7 }
 0x2c1   : > { %v846_v8 = vpop.f32.mrf.mxu2 }
 0x2c2   : > { %v2142_v9 = vadd.f32 %v846_v8, %v742_v1  ;;  %v653_v10 = vpop.f32.mrf.mxu0  ;;  %v743_v11 = vpop.f32.mrf.mxu1  ;;  %v895_v1 = vsel %vm887_vm4, %v876_v54, %v877_v62 }
 0x2c3   : > { %v744_v13 = vadd.f32 %v743_v11, %v653_v10 }
 0x2c4   : > { %984 = vrot.lane.b32.xlu0 %v2142_v9, %s1837_s27  ;;  %914 = vrot.lane.b32.xlu2 %v898_v12, %s1838_s20 }
 0x2c9   : > { %v848_v15 = vpop.f32.mrf.mxu2 }
 0x2ca   : > { %v2152_v16 = vadd.f32 %v848_v15, %v744_v13  ;;  %v656_v17 = vpop.f32.mrf.mxu0  ;;  %v746_v18 = vpop.f32.mrf.mxu1  ;;  %v879_v15 = vrot.slane %v2142_v9, 7 }
 0x2cb   : > { %v747_v19 = vadd.f32 %v746_v18, %v656_v17 }
 0x2cc   : > { %1096 = vrot.lane.b32.xlu2 %v1676_v14, %s1838_s20  ;;  %v880_v17 = vrot.slane %v2152_v16, 7  ;;  %v893_v18 = vsel %vm887_vm4, %v878_v3, %v879_v15 }
 0x2d1   : > { %v851_v21 = vpop.f32.mrf.mxu2 }
 0x2d2   : > { %v2156_v22 = vadd.f32 %v851_v21, %v747_v19  ;;  %v658_v23 = vpop.f32.mrf.mxu0  ;;  %v748_v24 = vpop.f32.mrf.mxu1  ;;  %v892_v19 = vsel %vm887_vm4, %v879_v15, %v880_v17 }
 0x2d3   : > { %v749_v26 = vadd.f32 %v748_v24, %v658_v23 }
 0x2d4   : > { %916 = vrot.lane.b32.xlu2 %v897_v25, %s1838_s20 }
 0x2d9   : > { %v853_v27 = vpop.f32.mrf.mxu2 }
 0x2da   : > { %v2161_v28 = vadd.f32 %v853_v27, %v749_v26  ;;  %v661_v29 = vpop.f32.mrf.mxu0  ;;  %v751_v30 = vpop.f32.mrf.mxu1 }
 0x2db   : > { %v752_v31 = vadd.f32 %v751_v30, %v661_v29 }
 0x2e1   : > { %v856_v32 = vpop.f32.mrf.mxu2 }
 0x2e2   : > { %v2163_v33 = vadd.f32 %v856_v32, %v752_v31  ;;  %v663_v34 = vpop.f32.mrf.mxu0  ;;  %v753_v36 = vpop.f32.mrf.mxu1 }
 0x2e3   : > { %v754_v37 = vadd.f32 %v753_v36, %v663_v34 }
 0x2e9   : > { %v858_v38 = vpop.f32.mrf.mxu2 }
 0x2ea   : > { %v2165_v39 = vadd.f32 %v858_v38, %v754_v37 }
 0x2ec   : > { %v884_v41 = vrot.slane %v2165_v39, 7 }
 0x2ee   : > { %v899_v42 = vsel %vm887_vm4, %v884_v41, %v873_v7  ;;  %v894_v7 = vsel %vm887_vm4, %v877_v62, %v878_v3 }
 0x2ef   : > { %912 = vrot.lane.b32.xlu1 %v899_v42, %s1838_s20 }
 0x306   : > { %v2173_v43 = vpop.permute.xlu0 %972 }
 0x307   : > { %v1008_v46 = vrot.slane %v2173_v43, 1 }
 0x30e   : > { %v975_v44 = vpop.permute.xlu0 %974  ;;  %v981_v53 = vpop.permute.xlu2 %980 }
 0x30f   : > { %v1009_v47 = vrot.slane %v975_v44, 1  ;;  %v1012_v56 = vrot.slane %v981_v53, 1 }
 0x311   : > { %v1031_v48 = vsel %vm1020_vm5, %v1008_v46, %v1009_v47 }
 0x312   : > { %1045 = vrot.lane.b32.xlu0 %v1031_v48, %s1838_s20 }
 0x316   : > { %v977_v49 = vpop.permute.xlu1 %976  ;;  %v983_v8 = vpop.permute.xlu2 %982 }
 0x317   : > { %v1010_v51 = vrot.slane %v977_v49, 1  ;;  %v1013_v10 = vrot.slane %v983_v8, 1  ;;  %v881_v49 = vrot.slane %v2156_v22, 7 }
 0x319   : > { %v1030_v52 = vsel %vm1020_vm5, %v1009_v47, %v1010_v51  ;;  %v1027_v13 = vsel %vm1020_vm5, %v1012_v56, %v1013_v10 }
 0x31a   : > { %986 = vrot.lane.b32.xlu0 %v2152_v16, %s1837_s27  ;;  %1047 = vrot.lane.b32.xlu1 %v1030_v52, %s1838_s20 }
 0x31e   : > { %v979_v57 = vpop.permute.xlu1 %978  ;;  %v915_v20 = vpop.permute.xlu2 %914 }
 0x31f   : > { %v1011_v58 = vrot.slane %v979_v57, 1  ;;  %v949_v27 = vadd.f32 %v915_v20, %v2117_v40 }
 0x321   : > { %v1028_v60 = vsel %vm1020_vm5, %v1011_v58, %v1012_v56  ;;  %v1029_v63 = vsel %vm1020_vm5, %v1010_v51, %v1011_v58 }
 0x322   : > { %918 = vrot.lane.b32.xlu0 %v896_v59, %s1838_s20  ;;  %988 = vrot.lane.b32.xlu1 %v2156_v22, %s1837_s27 }
 0x323   : > { %1051 = vrot.lane.b32.xlu2 %v1028_v60, %s1838_s20  ;;  %v891_v60 = vsel %vm887_vm4, %v880_v17, %v881_v49 }
 0x326   : > { %v2227_v21 = vpop.permute.xlu2 %1096 }
 0x32a   : > { %990 = vrot.lane.b32.xlu0 %v2161_v28, %s1837_s27  ;;  %1049 = vrot.lane.b32.xlu1 %v1029_v63, %s1838_s20 }
 0x32b   : > { %920 = vrot.lane.b32.xlu2 %v895_v1, %s1838_s20 }
 0x32e   : > { %v917_v36 = vpop.permute.xlu2 %916 }
 0x32f   : > { %v950_v58 = vadd.f32 %v917_v36, %v2121_v45 }
 0x332   : > { %922 = vrot.lane.b32.xlu0 %v894_v7, %s1838_s20  ;;  %992 = vrot.lane.b32.xlu1 %v2163_v33, %s1837_s27 }
 0x336   : > { %v985_v11 = vpop.permute.xlu0 %984 }
 0x337   : > { %v1014_v12 = vrot.slane %v985_v11, 1 }
 0x339   : > { %v1026_v14 = vsel %vm1020_vm5, %v1013_v10, %v1014_v12 }
 0x33a   : > { %994 = vrot.lane.b32.xlu0 %v2165_v39, %s1837_s27  ;;  %1053 = vrot.lane.b32.xlu1 %v1027_v13, %s1838_s20 }
 0x33b   : > { %1055 = vrot.lane.b32.xlu2 %v1026_v14, %s1838_s20 }
 0x342   : > { %924 = vrot.lane.b32.xlu1 %v893_v18, %s1838_s20  ;;  %v883_v18 = vrot.slane %v2163_v33, 7 }
 0x343   : > { %926 = vrot.lane.b32.xlu2 %v892_v19, %s1838_s20 }
 0x361   : > { %v913_v23 = vpop.permute.xlu1 %912 }
 0x362   : > { %v948_v25 = vadd.f32 %v913_v23, %v2113_v35  ;;  %v882_v35 = vrot.slane %v2161_v28, 7 }
 0x364   : > { %v890_v54 = vsel %vm887_vm4, %v881_v49, %v882_v35 }
 0x37d   : > { %v1052_v53 = vpop.permute.xlu2 %1051 }
 0x384   : > { %v1046_v24 = vpop.permute.xlu0 %1045 }
 0x385   : > { %v1081_v26 = vadd.f32 %v1046_v24, %v948_v25  ;;  %v921_v3 = vpop.permute.xlu2 %920  ;;  %v889_v25 = vsel %vm887_vm4, %v882_v35, %v883_v18 }
 0x386   : > { %v952_v23 = vadd.f32 %v921_v3, %v2129_v55 }
 0x387   : > { %v1099_v31 = vadd.f32 %v2227_v21, %v1081_v26 }
 0x389   : > { %v1111_v42 = vmax.f32 %v1099_v31, 0.0 }
 0x38c   : > { %v987_v29 = vpop.permute.xlu0 %986  ;;  %v1048_v30 = vpop.permute.xlu1 %1047 }
 0x38d   : > { %v1015_v32 = vrot.slane %v987_v29, 1  ;;  %v1082_v34 = vadd.f32 %v1048_v30, %v949_v27 }
 0x38f   : > { %v1100_v37 = vadd.f32 %v2227_v21, %v1082_v34  ;;  %v1025_v38 = vsel %vm1020_vm5, %v1014_v12, %v1015_v32 }
 0x390   : > { %1057 = vrot.lane.b32.xlu1 %v1025_v38, %s1838_s20 }
 0x391   : > { %v1112_v44 = vmax.f32 %v1100_v37, 0.0  ;;  %v1129_v37 = vld [vmem:[%s2393_s5] sm:$0x3] }
 0x392   : > { %v1171_v38 = vsel %vm623_vm2, %v1129_v37, 0 }
 0x393   : > { %v1123_v47 = vpack.c.bf16 %v1112_v44, %v1111_v42  ;;  %1180 = vmatpush.bf16.msra.mxu3 %v1171_v38 }
 0x394   : > { %v919_v40 = vpop.permute.xlu0 %918  ;;  %v989_v48 = vpop.permute.xlu1 %988 }
 0x395   : > { %v951_v51 = vadd.f32 %v919_v40, %v2125_v50  ;;  %v1016_v52 = vrot.slane %v989_v48, 1  ;;  %1140 = vrot.lane.b32.xlu0 %v1123_v47, %s1839_s23  ;;  %v1056_v19 = vpop.permute.xlu2 %1055 }
 0x397   : > { %v1024_v56 = vsel %vm1020_vm5, %v1015_v32, %v1016_v52  ;;  %v1084_v57 = vadd.f32 %v1052_v53, %v951_v51 }
 0x398   : > { %930 = vrot.lane.b32.xlu1 %v890_v54, %s1838_s20  ;;  %1059 = vrot.lane.b32.xlu2 %v1024_v56, %s1838_s20 }
 0x399   : > { %v1102_v62 = vadd.f32 %v2227_v21, %v1084_v57 }
 0x39b   : > { %v1114_v8 = vmax.f32 %v1102_v62, 0.0 }
 0x39c   : > { %v991_v59 = vpop.permute.xlu0 %990  ;;  %v1050_v50 = vpop.permute.xlu1 %1049 }
 0x39d   : > { %v1083_v63 = vadd.f32 %v1050_v50, %v950_v58  ;;  %928 = vrot.lane.b32.xlu0 %v891_v60, %s1838_s20  ;;  %v1017_v7 = vrot.slane %v991_v59, 1  ;;  %v927_v43 = vpop.permute.xlu2 %926 }
 0x39f   : > { %v1101_v1 = vadd.f32 %v2227_v21, %v1083_v63  ;;  %v1023_v45 = vsel %vm1020_vm5, %v1016_v52, %v1017_v7 }
 0x3a1   : > { %v1113_v10 = vmax.f32 %v1101_v1, 0.0 }
 0x3a3   : > { %v1124_v11 = vpack.c.bf16 %v1114_v8, %v1113_v10 }
 0x3a4   : > { %v923_v12 = vpop.permute.xlu0 %922  ;;  %v993_v13 = vpop.permute.xlu1 %992 }
 0x3a5   : > { %v953_v14 = vadd.f32 %v923_v12, %v2133_v61  ;;  %v1018_v15 = vrot.slane %v993_v13, 1  ;;  %1061 = vrot.lane.b32.xlu0 %v1023_v45, %s1838_s20  ;;  %1142 = vrot.lane.b32.xlu2 %v1124_v11, %s1839_s23  ;;  %v888_v61 = vsel %vm887_vm4, %v883_v18, %v884_v41 }
 0x3a7   : > { %v1022_v17 = vsel %vm1020_vm5, %v1017_v7, %v1018_v15  ;;  %v1086_v20 = vadd.f32 %v1056_v19, %v953_v14 }
 0x3a8   : > { %1063 = vrot.lane.b32.xlu1 %v1022_v17, %s1838_s20 }
 0x3a9   : > { %v1104_v26 = vadd.f32 %v2227_v21, %v1086_v20 }
 0x3ab   : > { %v1116_v31 = vmax.f32 %v1104_v26, 0.0 }
 0x3ac   : > { %v1054_v24 = vpop.permute.xlu1 %1053  ;;  %v995_v27 = vpop.permute.xlu0 %994 }
 0x3ad   : > { %v1085_v29 = vadd.f32 %v1054_v24, %v952_v23  ;;  %934 = vrot.lane.b32.xlu0 %v888_v61, %s1838_s20  ;;  %932 = vrot.lane.b32.xlu2 %v889_v25, %s1838_s20  ;;  %v1019_v55 = vrot.slane %v995_v27, 1  ;;  %v1208_v24 = vunpack.c.l.bf16 %v2019_v2 }
 0x3af   : > { %v1103_v30 = vadd.f32 %v2227_v21, %v1085_v29  ;;  %v1032_v41 = vsel %vm1020_vm5, %v1019_v55, %v1008_v46  ;;  %v1021_v36 = vsel %vm1020_vm5, %v1018_v15, %v1019_v55  ;;  %v955_v46 = vadd.f32 %v927_v43, %v2152_v16 }
 0x3b0   : > { %v1209_v29 = vunpack.c.h.bf16 %v2019_v2  ;;  %v1211_v2 = vunpack.c.h.bf16 %v2023_v4 }
 0x3b1   : > { %v1115_v32 = vmax.f32 %v1103_v30, 0.0 }
 0x3b3   : > { %v1125_v34 = vpack.c.bf16 %v1116_v31, %v1115_v32 }
 0x3b4   : > { %v925_v42 = vpop.permute.xlu1 %924 }
 0x3b5   : > { %1067 = vrot.lane.b32.xlu0 %v1032_v41, %s1838_s20  ;;  %1065 = vrot.lane.b32.xlu2 %v1021_v36, %s1838_s20  ;;  %v954_v35 = vadd.f32 %v925_v42, %v2142_v9  ;;  %v1210_v36 = vunpack.c.l.bf16 %v2023_v4  ;;  %v1213_v4 = vunpack.c.h.bf16 %v2026_v5 }
 0x3b6   : > { %1144 = vrot.lane.b32.xlu1 %v1125_v34, %s1839_s23 }
 0x3f2   : > { %v1060_v44 = vpop.permute.xlu2 %1059 }
 0x3f3   : > { %v1088_v0 = vadd.f32 %v1060_v44, %v955_v46 }
 0x3f5   : > { %v1106_v40 = vadd.f32 %v2227_v21, %v1088_v0 }
 0x3f7   : > { %v1118_v51 = vmax.f32 %v1106_v40, 0.0  ;;  %v1212_v40 = vunpack.c.l.bf16 %v2026_v5  ;;  %v1215_v5 = vunpack.c.h.bf16 %v2029_v6 }
 0x3ff   : > { %v1143_v56 = vpop.permute.xlu2 %1142 }
 0x402   : > { %v1058_v47 = vpop.permute.xlu1 %1057 }
 0x403   : > { %v1087_v48 = vadd.f32 %v1058_v47, %v954_v35 }
 0x405   : > { %v1105_v49 = vadd.f32 %v2227_v21, %v1087_v48 }
 0x407   : > { %v1117_v52 = vmax.f32 %v1105_v49, 0.0  ;;  %v1141_v53 = vpop.permute.xlu0 %1140  ;;  %v933_v9 = vpop.permute.xlu2 %932 }
 0x408   : > { %1512 = vmatmul.msk.bf16.vlgmr.msra.gmra.mxu3 %vm604_vm3, %v1141_v53 }
 0x409   : > { %v1126_v54 = vpack.c.bf16 %v1118_v51, %v1117_v52 }
 0x40a   : > { %v931_v16 = vpop.permute.xlu1 %930 }
 0x40b   : > { %1146 = vrot.lane.b32.xlu1 %v1126_v54, %s1839_s23  ;;  %v957_v60 = vadd.f32 %v931_v16, %v2161_v28 }
 0x40f   : > { %v929_v57 = vpop.permute.xlu0 %928  ;;  %v1066_v11 = vpop.permute.xlu2 %1065 }
 0x410   : > { %v956_v58 = vadd.f32 %v929_v57, %v2156_v22  ;;  %v958_v22 = vadd.f32 %v933_v9, %v2163_v33 }
 0x412   : > { %v1091_v13 = vadd.f32 %v1066_v11, %v958_v22 }
 0x414   : > { %v1109_v28 = vadd.f32 %v2227_v21, %v1091_v13 }
 0x416   : > { %v1121_v19 = vmax.f32 %v1109_v28, 0.0 }
 0x417   : > { %v1062_v59 = vpop.permute.xlu0 %1061 }
 0x418   : > { %v1089_v50 = vadd.f32 %v1062_v59, %v956_v58  ;;  %1513 = vmatmul.msk.bf16.gmra.mxu3 %vm604_vm3, %v1143_v56  ;;  %v1214_v58 = vunpack.c.l.bf16 %v2029_v6 }
 0x41a   : > { %v1064_v62 = vpop.permute.xlu1 %1063  ;;  %v1107_v63 = vadd.f32 %v2227_v21, %v1089_v50 }
 0x41b   : > { %v1090_v1 = vadd.f32 %v1064_v62, %v957_v60 }
 0x41c   : > { %v1119_v7 = vmax.f32 %v1107_v63, 0.0 }
 0x41d   : > { %v1108_v3 = vadd.f32 %v2227_v21, %v1090_v1 }
 0x41f   : > { %v1120_v8 = vmax.f32 %v1108_v3, 0.0  ;;  %v935_v10 = vpop.permute.xlu0 %934 }
 0x420   : > { %v959_v45 = vadd.f32 %v935_v10, %v2165_v39  ;;  %v1677_v39 = vld [vmem:[%s2394_s6] ss:$0 sm:$0xff] }
 0x421   : > { %v1127_v12 = vpack.c.bf16 %v1120_v8, %v1119_v7 }
 0x423   : > { %1148 = vrot.lane.b32.xlu2 %v1127_v12, %s1839_s23 }
 0x427   : > { %v1068_v14 = vpop.permute.xlu0 %1067 }
 0x428   : > { %v1092_v15 = vadd.f32 %v1068_v14, %v959_v45  ;;  %v1145_v17 = vpop.permute.xlu1 %1144 }
 0x429   : > { %1514 = vmatmul.msk.bf16.gmra.mxu3 %vm604_vm3, %v1145_v17 }
 0x42a   : > { %v1110_v18 = vadd.f32 %v2227_v21, %v1092_v15 }
 0x42c   : > { %v1122_v20 = vmax.f32 %v1110_v18, 0.0 }
 0x42e   : > { %v1128_v23 = vpack.c.bf16 %v1122_v20, %v1121_v19 }
 0x430   : > { %1150 = vrot.lane.b32.xlu0 %v1128_v23, %s1839_s23 }
 0x47d   : > { %v1147_v33 = vpop.permute.xlu1 %1146  ;;  %v1149_v26 = vpop.permute.xlu2 %1148 }
 0x47e   : > { %1515 = vmatmul.msk.bf16.gmra.mxu3 %vm604_vm3, %v1147_v33 }
 0x48b   : > { %v1182_v61 = vpop.f32.mrf.mxu3 }
 0x48c   : > { %v1183_v25 = vadd.f32 %v1677_v39, %v1182_v61 }
 0x48e   : > { %v1216_v27 = vadd.f32 %v1208_v24, %v1183_v25  ;;  %1516 = vmatmul.msk.bf16.gmra.mxu3 %vm604_vm3, %v1149_v26 }
 0x490   : > { %v1224_v21 = vmax.f32 %v1216_v27, 0.0 }
 0x492   : > { %1232 = vst.msk [vmem:[%s2050_s16] sm:$0xff] %vm366_vm1, %v1224_v21 }
 0x493   : > { %v1184_v30 = vpop.f32.mrf.mxu3 }
 0x494   : > { %v1185_v55 = vadd.f32 %v1677_v39, %v1184_v30 }
 0x496   : > { %v1217_v31 = vadd.f32 %v1209_v29, %v1185_v55 }
 0x498   : > { %v1225_v32 = vmax.f32 %v1217_v31, 0.0 }
 0x49a   : > { %1233 = vst.msk [vmem:[%s2050_s16 + $0x8] sm:$0xff] %vm366_vm1, %v1225_v32 }
 0x49b   : > { %v1187_v34 = vpop.f32.mrf.mxu3 }
 0x4a2   : > { %v1151_v41 = vpop.permute.xlu0 %1150 }
 0x4a3   : > { %v1188_v37 = vpop.f32.mrf.mxu3  ;;  %1517 = vmatmul.msk.bf16.gmra.mxu3 %vm604_vm3, %v1151_v41 }
 0x4a4   : > { %v1189_v38 = vadd.f32 %v1677_v39, %v1188_v37 }
 0x4a6   : > { %v1218_v43 = vadd.f32 %v1210_v36, %v1189_v38 }
 0x4a8   : > { %v1226_v42 = vmax.f32 %v1218_v43, 0.0 }
 0x4aa   : > { %1234 = vst.msk [vmem:[%s2050_s16 + $0x10] sm:$0xff] %vm366_vm1, %v1226_v42 }
 0x4ac   : > { %v1191_v44 = vpop.f32.mrf.mxu3 }
 0x4ad   : > { %v1192_v46 = vadd.f32 %v1677_v39, %v1191_v44 }
 0x4af   : > { %v1219_v0 = vadd.f32 %v1211_v2, %v1192_v46 }
 0x4b1   : > { %v1227_v35 = vmax.f32 %v1219_v0, 0.0 }
 0x4b3   : > { %1235 = vst.msk [vmem:[%s2050_s16 + $0x18] sm:$0xff] %vm366_vm1, %v1227_v35 }
 0x4b4   : > { %v1193_v47 = vpop.f32.mrf.mxu3 }
 0x501   : > { %v1195_v48 = vpop.f32.mrf.mxu3 }
 0x502   : > { %v1196_v49 = vadd.f32 %v1677_v39, %v1195_v48 }
 0x504   : > { %v1220_v51 = vadd.f32 %v1212_v40, %v1196_v49 }
 0x506   : > { %v1228_v52 = vmax.f32 %v1220_v51, 0.0 }
 0x508   : > { %1236 = vst.msk [vmem:[%s2050_s16 + $0x20] sm:$0xff] %vm366_vm1, %v1228_v52 }
 0x509   : > { %v1197_v53 = vpop.f32.mrf.mxu3 }
 0x50a   : > { %v1198_v54 = vadd.f32 %v1677_v39, %v1197_v53 }
 0x50c   : > { %v1221_v56 = vadd.f32 %v1213_v4, %v1198_v54 }
 0x50e   : > { %v1229_v57 = vmax.f32 %v1221_v56, 0.0 }
 0x510   : > { %1237 = vst.msk [vmem:[%s2050_s16 + $0x28] sm:$0xff] %vm366_vm1, %v1229_v57 }
 0x511   : > { %v1200_v16 = vpop.f32.mrf.mxu3 }
 0x519   : > { %v1201_v9 = vpop.f32.mrf.mxu3 }
 0x51a   : > { %v1202_v59 = vadd.f32 %v1677_v39, %v1201_v9 }
 0x51c   : > { %v1222_v50 = vadd.f32 %v1214_v58, %v1202_v59 }
 0x51e   : > { %v1230_v60 = vmax.f32 %v1222_v50, 0.0 }
 0x520   : > { %1238 = vst.msk [vmem:[%s2050_s16 + $0x30] sm:$0xff] %vm366_vm1, %v1230_v60 }
 0x526   : > { %v1204_v62 = vpop.f32.mrf.mxu3 }
 0x527   : > { %v1205_v63 = vadd.f32 %v1677_v39, %v1204_v62 }
 0x529   : > { %v1223_v1 = vadd.f32 %v1215_v5, %v1205_v63 }
 0x52b   : > { %v1231_v3 = vmax.f32 %v1223_v1, 0.0 }
 0x52d   : > { %1239 = vst.msk [vmem:[%s2050_s16 + $0x38] sm:$0xff] %vm366_vm1, %v1231_v3 }
 0x52e   : > { %v1206_v7 = vpop.f32.mrf.mxu3 }
 0x52f   : > { %1735 = shalt.err (!%p1732_p6)
}
 0x530   : > { %s1840_s7 = smov 128   ;;  %s1841_s16 = smov 8  }
 0x531   : > { %1563 = dma.vmem_to_hbm [thread:$0]  (%p1964_p12), %s1257_s14, 1024, %s1259_s30, %s1241_s8, %s1840_s7, %s1840_s7, %s1841_s16  }
 0x532 PF: > { %p1574_p8 = scmp.ge.s32.totalorder %s1830_s11, 2  ;;  %s1273_s27 = sand.u32 1, %s1790_s24  }
 0x533   : > { %s1274_s20 = scalar_lea.sflag [#allocation5], %s1273_s27 }
 0x534   : > { %p1570_p3 = pnand %p1574_p8, %p1977_p2 }
 0x536   : > { %p1571_p7 = pneg %p1570_p3 }
 0x538   : > { %1785 = dma.done.wait (%p1571_p7), %s1274_s20, 1024  }
 0x539   : > { %1787 = vsyncadd (%p1571_p7), %s1274_s20, 4294966272  ;;  %s23_s11 = sadd.s32 1, %s1830_s11   ;;  %s2417_s15 = sld [smem:[#allocation15_spill]] }
 0x53a   : > { %p20_p9 = scmp.ge.s32.totalorder %s23_s11, 10   ;;  %s2418_s23 = sld [smem:[#allocation14_spill]] }
 0x53b   : > { %s2419_s30 = sld [smem:[#allocation9_spill]]  ;;  %s2423_s24 = smov %s1794_s25 }
 0x53c   : > { %s2420_s8 = sld [smem:[#allocation10_spill]]  ;;  %s2424_s25 = smov %s1798_s26 }
 0x53d   : > { %s2421_s9 = sld [smem:[#allocation11_spill]]  ;;  %s2426_s27 = smov %s1806_s28 }
 0x53e   : > { %s2422_s10 = sld [smem:[#allocation12_spill]]  ;;  %s2427_s28 = smov %s1810_s29 }
 0x53f   : > { %s2425_s26 = smov %s2417_s15  ;;  %22 = sbr.rel (!%p20_p9) target bundleno = 11 (0xb), region = 118 }
 0x540   : > { %s2428_s29 = smov %s2418_s23 }
 0x544   :  { %1280 = vsyncpa [#allocation4], 1 }
 0x545   :  { %1282 = vsyncpa [#allocation4 + $0x1], 1 }
 0x546   :  { %1283 = vsyncpa [#allocation5], 1 }
 0x547   :  { %1285 = vsyncpa [#allocation5 + $0x1], 1 }

// kernel: tpu_custom_call.1
= control target key start
LH: loop header
LB: loop body
LE: loop exit
PB: predicated region body
PF: predicated region fallthrough
CT: control target
= control target key end

     0   :  { %s2388_s0 = inlined_call_operand.hbm [shape: bf16[2,16,16,16], index: 0, kind: input, shape index: {}]   ;;  %s2389_s1 = inlined_call_operand.vmem [shape: bf16[16,4], index: 1, kind: input, shape index: {}]   ;;  %s2390_s2 = inlined_call_operand.vmem [shape: f32[1,4], index: 2, kind: input, shape index: {}]   ;;  %s2391_s3 = inlined_call_operand.vmem [shape: bf16[3,4,12], index: 3, kind: input, shape index: {}]   ;;  %s2392_s4 = inlined_call_operand.vmem [shape: f32[1,4], index: 4, kind: input, shape index: {}]   ;;  %s2393_s5 = inlined_call_operand.vmem [shape: bf16[4,16], index: 5, kind: input, shape index: {}]   ;;  %s2394_s6 = inlined_call_operand.vmem [shape: f32[1,16], index: 6, kind: input, shape index: {}]   ;;  %s2395_s7 = inlined_call_operand.hbm [shape: f32[2,16,16,16], index: 7, kind: output, shape index: {}]  }
   0x1   :  { %2403 = sst [smem:[#allocation16_spill]] %s2395_s7 }
   0x2   :  { %12 = vsyncpa [#allocation4], 0 }
   0x3   :  { %14 = vsyncpa [#allocation4 + $0x1], 0 }
   0x4   :  { %15 = vsyncpa [#allocation5], 0 }
   0x5   :  { %17 = vsyncpa [#allocation5 + $0x1], 0  ;;  %s1882_s24 = smov 0   ;;  %s1884_s25 = smov 0  }
   0x6   :  { %s1886_s26 = smov 0   ;;  %s1888_s27 = smov 0  }
   0x7   :  { %s1890_s28 = smov 0   ;;  %s1892_s29 = smov 0  }
   0x8   :  { %s1894_s30 = smov 0   ;;  %s1896_s8 = smov 0  }
   0x9   :  { %s1898_s9 = smov 0   ;;  %s1900_s10 = smov 0  }
   0xa   :  { %s1902_s11 = smov 0  }
   0xb LB: > { %2404 = sst [smem:[#allocation9_spill]] %s1822_s9  ;;  %s1354_s12 = sadd.s32 4294967295, %s1830_s11   ;;  %s1830_s11 = sphi %s1902_s11, %s23_s11   ;;  %s1826_s10 = sphi %s1900_s10, %s2422_s10   ;;  %s1822_s9 = sphi %s1898_s9, %s2421_s9   ;;  %s1818_s8 = sphi %s1896_s8, %s2420_s8   ;;  %s1814_s30 = sphi %s1894_s30, %s2419_s30   ;;  %s1810_s29 = sphi %s1892_s29, %s2428_s29   ;;  %s1806_s28 = sphi %s1890_s28, %s2427_s28   ;;  %s1802_s27 = sphi %s1888_s27, %s2426_s27   ;;  %s1798_s26 = sphi %s1886_s26, %s2425_s26   ;;  %s1794_s25 = sphi %s1884_s25, %s2424_s25   ;;  %s1790_s24 = sphi %s1882_s24, %s2423_s24  }
   0xc   : > { %2405 = sst [smem:[#allocation10_spill]] %s1826_s10  ;;  %s1355_s13 = sadd.s32 4294967294, %s1830_s11  }
   0xd   : > { %s32_s14 = sadd.s32 1, %s1822_s9  ;;  %s35_s15 = sadd.s32 1, %s1826_s10 }
   0xe   : > { %p33_p0 = scmp.ge.s32.totalorder %s32_s14, 4  ;;  %s42_s16 = sadd.s32 1, %s1810_s29 }
   0xf   : > { %p49_p1 = scmp.ne.s32.totalorder %s1810_s29, %s1806_s28  ;;  %p50_p2 = scmp.eq.s32.totalorder %s1830_s11, 0 }
  0x10   : > { %s2430_s14 = smov (%p33_p0, %s32_s14), 0  ;;  %s2432_s15 = smov (!%p33_p0, %s35_s15), %s1826_s10 }
  0x11   : > { %2406 = sst [smem:[#allocation11_spill]] %s2430_s14  ;;  %p1946_p3 = por %p50_p2, %p49_p1 }
  0x12   : > { %p55_p4 = scmp.ne.s32.totalorder %s1806_s28, %s1802_s27  ;;  %p37_p5 = scmp.ge.s32.totalorder %s2432_s15, 2 }
  0x13   : > { %p56_p6 = scmp.eq.s32.totalorder %s1354_s12, 0  ;;  %s192_s18 = ssub.s32 %s1822_s9, %s2430_s14 }
  0x14   : > { %s196_s19 = sadd.s32 1, %s1798_s26  ;;  %s2434_s15 = smov (%p37_p5, %s2432_s15), 0 }
  0x15   : > { %2408 = sst [smem:[#allocation12_spill]] %s2434_s15  ;;  %p1956_p7 = por %p56_p6, %p55_p4 }
  0x16   : > { %p206_p8 = scmp.ne.s32.totalorder %s1798_s26, %s1794_s25  ;;  %s39_s21 = ssub.s32 %s1826_s10, %s2434_s15 }
  0x17   : > { %p207_p9 = scmp.eq.s32.totalorder %s1354_s12, 7  ;;  %p40_p10 = scmp.eq.s32.totalorder %s39_s21, 0 }
  0x18   : > { %s193_s22 = sor.u32 %s192_s18, %s39_s21  ;;  %p212_p13 = scmp.ne.s32.totalorder %s1794_s25, %s1790_s24 }
  0x19   : > { %p194_p11 = scmp.eq.s32.totalorder %s193_s22, 0  ;;  %p1964_p12 = por %p207_p9, %p206_p8 }
  0x1a   : > { %s1969_s27 = scalar_select %p40_p10, %s1810_s29, %s42_s16  }
  0x1b   : > { %s2410_s23 = scalar_select %p1964_p12, 1, 0 }
  0x1c   : > { %2412 = sst [smem:[#allocation14_spill]] %s1969_s27  ;;  %p213_p0 = scmp.eq.s32.totalorder %s1355_s13, 7 }
  0x1d   : > { %2411 = sst [smem:[#allocation13_spill]] %s2410_s23  ;;  %p1573_p1 = scmp.lt.s32.totalorder %s1830_s11, 8 }
  0x1e   : > { %s1972_s14 = scalar_select %p194_p11, %s1798_s26, %s196_s19  }
  0x1f   : > { %p1977_p2 = por %p213_p0, %p212_p13  ;;  %s251_s12 = sand.u32 1, %s1810_s29  }
  0x20   : > { %2413 = sst [smem:[#allocation15_spill]] %s1972_s14  ;;  %s1358_s18 = sshll.u32 %s251_s12, 7 }
  0x21   : > { %s1525_s21 = sshll.u32 %s1826_s10, 7  ;;  %s255_s16 = scalar_lea.vmem [#allocation3], %s1358_s18 }
  0x22   : > { %s260_s23 = scalar_lea.hbm %s2388_s0, %s1525_s21  ;;  %s263_s27 = sshll.u32 %s255_s16, 4  ;;  %s264_s27 = int_to_ptr.vmem [resolvable:$true] %s263_s27 }
  0x23   : > { %s261_s7 = sshll.u32 %s260_s23, 4  ;;  %p1566_p4 = pnand %p1573_p1, %p1946_p3  ;;  %s262_s7 = int_to_ptr.hbm [resolvable:$true] %s261_s7 }
  0x24   : > { %p1361_p5 = scmp.ge.s32.totalorder %s1830_s11, 1  ;;  %s252_s13 = scalar_lea.sflag [#allocation4], %s251_s12 }
  0x25   : > { %s1832_s19 = smov 64   ;;  %s1833_s14 = smov 4  }
  0x26   : > { %1568 = dma.hbm_to_vmem [thread:$0]  (!%p1566_p4), %s262_s7, 2048, %s264_s27, %s252_s13, %s1832_s19, %s1832_s19, %s1833_s14  }
  0x27   : > { %p271_p6 = scmp.lt.s32.totalorder %s1830_s11, 9 }
  0x29   : > { %p272_p8 = pnand %p1361_p5, %p271_p6 }
  0x2a   : > { %s277_s10 = sand.u32 (!%p272_p8), 1, %s1806_s28  }
  0x2b   : > { %275 = sbr.rel (%p272_p8) target bundleno = 1330 (0x532), region = 48  ;;  %s1991_s15 = sshll.u32 (!%p272_p8), %s277_s10, 7 }
  0x2c   : > { %s278_s18 = scalar_lea.sflag (!%p272_p8), [#allocation4], %s277_s10  ;;  %s281_s23 = scalar_lea.vmem (!%p272_p8), [#allocation3], %s1991_s15 }
  0x30   : > { %1781 = dma.done.wait (%p1956_p7), %s278_s18, 2048  }
  0x31   : > { %1783 = vsyncadd (%p1956_p7), %s278_s18, 4294965248  ;;  %s310_s7 = sand.u32 1, %s1794_s25   ;;  %s1364_s14 = sshll.u32 %s1814_s30, 2  ;;  %vm316_vm0 = vcmask 27648   ;;  %v1834_v0 = vmov 0   ;;  %v1532_v1 = vld [vmem:[%s2389_s1] sm:$0xff] }
  0x32   : > { %s2002_s17 = sshll.u32 %s310_s7, 6  ;;  %s1527_s27 = sshll.u32 %s1814_s30, 5  ;;  %317 = vst.msk [vmem:[#allocation2 + $0x8] sm:$0xf] %vm316_vm0, %v1834_v0  ;;  %386 = vmatpush.bf16.msra.mxu0 %v1532_v1  ;;  %1558 = vmatpush.bf16.msra.mxu1 %v1532_v1  ;;  %vm366_vm1 = vcmask 130048  }
  0x33   : > { %318 = vst.msk [vmem:[#allocation2 + $0x14] sm:$0xf] %vm316_vm0, %v1834_v0  ;;  %s2010_s10 = scalar_lea.vmem %s281_s23, %s1527_s27 [#allocation3]  ;;  %1559 = vmatpush.bf16.msra.mxu2 %v1532_v1  ;;  %1560 = vmatpush.bf16.msra.mxu3 %v1532_v1  ;;  %v1673_v10 = vld [vmem:[%s2390_s2] ss:$0 sm:$0xff]  ;;  %s2050_s16 = scalar_lea.vmem [#allocation6], %s2002_s17 }
  0x34   : > { %319 = vst.msk [vmem:[#allocation2 + $0x20] sm:$0xf] %vm316_vm0, %v1834_v0  ;;  %v2019_v2 = vld [vmem:[%s2010_s10] sm:$0xff]   ;;  %v2023_v4 = vld [vmem:[%s2010_s10 + $0x8] sm:$0xff]   ;;  %v2026_v5 = vld [vmem:[%s2010_s10 + $0x10] sm:$0xff]   ;;  %p1391_p3 = scmp.ne.s32.totalorder %s1814_s30, 0 }
  0x35   : > { %320 = vst.msk [vmem:[#allocation2 + $0x2c] sm:$0xf] %vm316_vm0, %v1834_v0  ;;  %v1528_v3 = vld [vmem:[%s2010_s10] sm:$0xff]  ;;  %v2029_v6 = vld [vmem:[%s2010_s10 + $0x18] sm:$0xff]   ;;  %v1529_v7 = vld [vmem:[%s2010_s10 + $0x8] sm:$0xff] }
  0x36   : > { %321 = vst.msk [vmem:[#allocation2 + $0x38] sm:$0xf] %vm316_vm0, %v1834_v0  ;;  %v1530_v8 = vld [vmem:[%s2010_s10 + $0x10] sm:$0xff]  ;;  %v1531_v9 = vld [vmem:[%s2010_s10 + $0x18] sm:$0xff]  ;;  %1387 = vmatmul.msk.bf16.vlgmr.msra.gmra.mxu0 %vm366_vm1, %v1528_v3  ;;  %1388 = vmatmul.msk.bf16.vlgmr.msra.gmra.mxu1 %vm366_vm1, %v1529_v7 }
  0x37   : > { %322 = vst.msk [vmem:[#allocation2 + $0x44] sm:$0xf] %vm316_vm0, %v1834_v0  ;;  %1389 = vmatmul.msk.bf16.vlgmr.msra.gmra.mxu2 %vm366_vm1, %v1530_v8  ;;  %1390 = vmatmul.msk.bf16.vlgmr.msra.gmra.mxu3 %vm366_vm1, %v1531_v9 }
  0xb3   : > { %v388_v11 = vpop.f32.mrf.mxu0  ;;  %v393_v12 = vpop.f32.mrf.mxu1 }
  0xb4   : > { %v389_v13 = vadd.f32 %v1673_v10, %v388_v11  ;;  %v394_v14 = vadd.f32 %v1673_v10, %v393_v12 }
  0xb6   : > { %v408_v15 = vmax.f32 %v389_v13, 0.0  ;;  %v410_v16 = vmax.f32 %v394_v14, 0.0 }
  0xb8   : > { %v416_v17 = vpack.c.bf16 %v408_v15, %v408_v15  ;;  %v418_v18 = vpack.c.bf16 %v410_v16, %v410_v16 }
  0xba   : > { %425 = vst.msk [vmem:[#allocation2 + $0xc] sm:$0xf] %vm316_vm0, %v416_v17  ;;  %v398_v19 = vpop.f32.mrf.mxu2  ;;  %v403_v20 = vpop.f32.mrf.mxu3 }
  0xbb   : > { %427 = vst.msk [vmem:[#allocation2 + $0x18] sm:$0xf] %vm316_vm0, %v418_v18  ;;  %v399_v21 = vadd.f32 %v1673_v10, %v398_v19  ;;  %v404_v22 = vadd.f32 %v1673_v10, %v403_v20  ;;  %v390_v23 = vpop.f32.mrf.mxu0  ;;  %v395_v24 = vpop.f32.mrf.mxu1 }
  0xbc   : > { %v391_v25 = vadd.f32 %v1673_v10, %v390_v23  ;;  %v396_v26 = vadd.f32 %v1673_v10, %v395_v24 }
  0xbd   : > { %v412_v27 = vmax.f32 %v399_v21, 0.0  ;;  %v414_v28 = vmax.f32 %v404_v22, 0.0 }
  0xbe   : > { %v409_v29 = vmax.f32 %v391_v25, 0.0  ;;  %v411_v30 = vmax.f32 %v396_v26, 0.0 }
  0xbf   : > { %v420_v31 = vpack.c.bf16 %v412_v27, %v412_v27  ;;  %v422_v32 = vpack.c.bf16 %v414_v28, %v414_v28 }
  0xc0   : > { %v417_v33 = vpack.c.bf16 %v409_v29, %v409_v29  ;;  %v419_v34 = vpack.c.bf16 %v411_v30, %v411_v30 }
  0xc1   : > { %429 = vst.msk [vmem:[#allocation2 + $0x24] sm:$0xf] %vm316_vm0, %v420_v31 }
  0xc2   : > { %431 = vst.msk [vmem:[#allocation2 + $0x30] sm:$0xf] %vm316_vm0, %v422_v32  ;;  %v400_v35 = vpop.f32.mrf.mxu2  ;;  %v405_v36 = vpop.f32.mrf.mxu3 }
  0xc3   : > { %426 = vst.msk [vmem:[#allocation2 + $0x10] sm:$0xf] %vm316_vm0, %v417_v33  ;;  %v401_v37 = vadd.f32 %v1673_v10, %v400_v35  ;;  %v406_v38 = vadd.f32 %v1673_v10, %v405_v36 }
  0xc4   : > { %428 = vst.msk [vmem:[#allocation2 + $0x1c] sm:$0xf] %vm316_vm0, %v419_v34 }
  0xc5   : > { %v413_v39 = vmax.f32 %v401_v37, 0.0  ;;  %v415_v40 = vmax.f32 %v406_v38, 0.0 }
  0xc6   : > { %436 = sbr.rel (%p1391_p3) target bundleno = 206 (0xce), region = 56 }
  0xc7   : > { %v421_v41 = vpack.c.bf16 %v413_v39, %v413_v39  ;;  %v423_v42 = vpack.c.bf16 %v415_v40, %v415_v40 }
  0xc9   : > { %430 = vst.msk [vmem:[#allocation2 + $0x28] sm:$0xf] %vm316_vm0, %v421_v41 }
  0xca   : > { %432 = vst.msk [vmem:[#allocation2 + $0x34] sm:$0xf] %vm316_vm0, %v423_v42 }
  0xcb   : > { %v1835_v43 = vmov 0  }
  0xcc   : > { %437 = vst.msk [vmem:[#allocation2] sm:$0xf] %vm316_vm0, %v1835_v43 }
  0xcd   : > { %438 = vst.msk [vmem:[#allocation2 + $0x4] sm:$0xf] %vm316_vm0, %v1835_v43 }
  0xce PF: > { %p1392_p7 = scmp.le.s32.totalorder %s1814_s30, 0 }
  0xcf   : > { %s1393_s18 = sadd.s32 (!%p1392_p7), 4294967295, %s1364_s14 }
  0xd0   : > { %442 = sbr.rel (%p1392_p7) target bundleno = 358 (0x166), region = 60  ;;  %s1533_s17 = sshll.u32 (!%p1392_p7), %s1393_s18, 3 }
  0xd1   : > { %s446_s27 = scalar_lea.vmem (!%p1392_p7), %s281_s23, %s1533_s17 [#allocation3] }
  0xd5   : > { %v1535_v44 = vld [vmem:[%s2389_s1] sm:$0xff] }
  0xd6   : > { %476 = vmatpush.bf16.msra.mxu0 %v1535_v44  ;;  %v1534_v45 = vld [vmem:[%s446_s27] sm:$0xff] }
  0xd7   : > { %v1674_v46 = vld [vmem:[%s2390_s2] ss:$0 sm:$0xff] }
  0xd9   : > { %1404 = vmatmul.msk.bf16.vlgmr.msra.gmra.mxu0 %vm366_vm1, %v1534_v45 }
 0x156   : > { %v478_v47 = vpop.f32.mrf.mxu0 }
 0x157   : > { %v479_v48 = vadd.f32 %v1674_v46, %v478_v47 }
 0x159   : > { %v483_v49 = vmax.f32 %v479_v48, 0.0 }
 0x15b   : > { %v485_v50 = vpack.c.bf16 %v483_v49, %v483_v49 }
 0x15d   : > { %487 = vst.msk [vmem:[#allocation2] sm:$0xf] %vm316_vm0, %v485_v50 }
 0x15e   : > { %v480_v51 = vpop.f32.mrf.mxu0 }
 0x15f   : > { %v481_v52 = vadd.f32 %v1674_v46, %v480_v51 }
 0x161   : > { %v484_v53 = vmax.f32 %v481_v52, 0.0 }
 0x163   : > { %v486_v54 = vpack.c.bf16 %v484_v53, %v484_v53 }
 0x165   : > { %488 = vst.msk [vmem:[#allocation2 + $0x4] sm:$0xf] %vm316_vm0, %v486_v54 }
 0x166 PF: > { %p1405_p9 = scmp.ne.s32.totalorder %s1814_s30, 3 }
 0x168   : > { %492 = sbr.rel (%p1405_p9) target bundleno = 368 (0x170), region = 64 }
 0x16d   : > { %v1836_v55 = vmov 0  }
 0x16e   : > { %494 = vst.msk [vmem:[#allocation2 + $0x3c] sm:$0xf] %vm316_vm0, %v1836_v55 }
 0x16f   : > { %495 = vst.msk [vmem:[#allocation2 + $0x40] sm:$0xf] %vm316_vm0, %v1836_v55 }
 0x170 PF: > { %p1406_p10 = scmp.ge.s32.totalorder %s1814_s30, 3 }
 0x172   : > { %499 = sbr.rel (%p1406_p10) target bundleno = 520 (0x208), region = 68 }
 0x177   : > { %v1538_v56 = vld [vmem:[%s2389_s1] sm:$0xff] }
 0x178   : > { %v1537_v57 = vld [vmem:[%s2010_s10 + $0x20] sm:$0xff]  ;;  %533 = vmatpush.bf16.msra.mxu0 %v1538_v56 }
 0x179   : > { %v1675_v58 = vld [vmem:[%s2390_s2] ss:$0 sm:$0xff] }
 0x17b   : > { %1419 = vmatmul.msk.bf16.vlgmr.msra.gmra.mxu0 %vm366_vm1, %v1537_v57 }
 0x1f8   : > { %v535_v59 = vpop.f32.mrf.mxu0 }
 0x1f9   : > { %v536_v60 = vadd.f32 %v1675_v58, %v535_v59 }
 0x1fb   : > { %v540_v61 = vmax.f32 %v536_v60, 0.0 }
 0x1fd   : > { %v542_v62 = vpack.c.bf16 %v540_v61, %v540_v61 }
 0x1ff   : > { %545 = vst.msk [vmem:[#allocation2 + $0x3c] sm:$0xf] %vm316_vm0, %v542_v62 }
 0x200   : > { %v537_v63 = vpop.f32.mrf.mxu0 }
 0x201   : > { %v538_v0 = vadd.f32 %v1675_v58, %v537_v63 }
 0x203   : > { %v541_v1 = vmax.f32 %v538_v0, 0.0 }
 0x205   : > { %v543_v3 = vpack.c.bf16 %v541_v1, %v541_v1 }
 0x207   : > { %546 = vst.msk [vmem:[#allocation2 + $0x40] sm:$0xf] %vm316_vm0, %v543_v3 }
 0x208 PF: > { %v1420_v7 = vld [vmem:[%s2391_s3 + $0x2] sm:$0x3]  ;;  %vm623_vm2 = vcmask 1041408   ;;  %v559_v8 = vld [vmem:[%s2391_s3] sm:$0x3]  ;;  %v1545_v12 = vld [vmem:[#allocation2 + $0xc] sm:$0xff]  ;;  %v885_v59 = vlaneseq }
 0x209   : > { %v625_v9 = vsel %vm623_vm2, %v1420_v7, 0  ;;  %v715_v10 = vsel %vm623_vm2, %v559_v8, 0  ;;  %v1481_v11 = vld [vmem:[%s2391_s3 + $0x4] sm:$0x3]  ;;  %vm604_vm3 = vcmask 31744   ;;  %v1551_v15 = vld [vmem:[#allocation2 + $0x18] sm:$0xff] }
 0x20a   : > { %v1539_v13 = vld [vmem:[#allocation2] sm:$0xff]  ;;  %634 = vmatpush.bf16.msra.mxu0 %v625_v9  ;;  %724 = vmatpush.bf16.msra.mxu1 %v715_v10  ;;  %v820_v14 = vsel %vm623_vm2, %v1481_v11, 0  ;;  %v1546_v16 = vld [vmem:[#allocation2 + $0x14] sm:$0xff]  ;;  %v1540_v17 = vld [vmem:[#allocation2 + $0x8] sm:$0xff]  ;;  %s1837_s27 = smov 120   ;;  %v2137_v0 = vshrl.u32 %v885_v59, 7 }
 0x20b   : > { %829 = vmatpush.bf16.msra.mxu2 %v820_v14  ;;  %v1552_v18 = vld [vmem:[#allocation2 + $0x20] sm:$0xff]  ;;  %v1541_v20 = vld [vmem:[#allocation2 + $0x10] sm:$0xff]  ;;  %v1553_v21 = vld [vmem:[#allocation2 + $0x28] sm:$0xff]  ;;  %s1838_s20 = smov 4   ;;  %s1839_s23 = smov 124  }
 0x20c   : > { %v1547_v19 = vld [vmem:[#allocation2 + $0x1c] sm:$0xff]  ;;  %v1548_v22 = vld [vmem:[#allocation2 + $0x24] sm:$0xff]  ;;  %v1554_v24 = vld [vmem:[#allocation2 + $0x30] sm:$0xff]  ;;  %vm887_vm4 = vcmp.lt.s32.totalorder %v2137_v0, 1  ;;  %vm1020_vm5 = vcmp.lt.s32.totalorder %v2137_v0, 7  ;;  %s1557_s13 = sshll.u32 %s1814_s30, 3 }
 0x20d   : > { %1445 = vmatmul.msk.bf16.vlgmr.msra.gmra.mxu0 %vm604_vm3, %v1545_v12  ;;  %1475 = vmatmul.msk.bf16.vlgmr.msra.gmra.mxu1 %vm604_vm3, %v1539_v13  ;;  %v1542_v23 = vld [vmem:[#allocation2 + $0x18] sm:$0xff]  ;;  %v1549_v25 = vld [vmem:[#allocation2 + $0x2c] sm:$0xff]  ;;  %v1543_v26 = vld [vmem:[#allocation2 + $0x20] sm:$0xff]  ;;  %s1521_s19 = sshll.u32 %s1818_s8, 5  ;;  %s2415_s12 = sld [smem:[#allocation16_spill]] }
 0x20e   : > { %1506 = vmatmul.msk.bf16.vlgmr.msra.gmra.mxu2 %vm604_vm3, %v1551_v15  ;;  %v1555_v27 = vld [vmem:[#allocation2 + $0x38] sm:$0xff]  ;;  %v1544_v29 = vld [vmem:[#allocation2 + $0x28] sm:$0xff]  ;;  %v1556_v30 = vld [vmem:[#allocation2 + $0x40] sm:$0xff]  ;;  %s1253_s18 = sadd.s32 %s1557_s13, %s1521_s19  ;;  %s1256_s14 = sshll.u32 %s2050_s16, 4  ;;  %s1257_s14 = int_to_ptr.vmem [resolvable:$true] %s1256_s14 }
 0x20f   : > { %v1550_v28 = vld [vmem:[#allocation2 + $0x34] sm:$0xff]  ;;  %v1676_v14 = vld [vmem:[%s2392_s4] ss:$0 sm:$0xff]  ;;  %s1522_s17 = sshll.u32 %s1253_s18, 3  ;;  %s1241_s8 = scalar_lea.sflag [#allocation5], %s310_s7 }
 0x213   : > { %s1255_s15 = scalar_lea.hbm %s2415_s12, %s1522_s17  ;;  %s1728_s19 = scalar_lea.hbm %s2415_s12, 512 }
 0x214   : > { %s1258_s30 = sshll.u32 %s1255_s15, 4  ;;  %s1259_s30 = int_to_ptr.hbm [resolvable:$true] %s1258_s30 }
 0x215   : > { %s1722_s21 = sshra.s32 %s1259_s30, 4  ;;  %s1723_s21 = int_to_ptr.hbm [resolvable:$true] %s1722_s21 }
 0x216   : > { %s1724_s10 = scalar_lea.hbm %s1723_s21, 64  ;;  %p1729_p1 = scmp.lt.s32.totalorder %s1723_s21, %s2415_s12 }
 0x217   : > { %p1725_p11 = scmp.ne.s32.totalorder %s1723_s21, %s1724_s10  ;;  %p1730_p4 = scmp.lt.s32.totalorder %s1728_s19, %s1724_s10 }
 0x219   : > { %p1726_p13 = pnand %p1725_p11, %p1964_p12  ;;  %p1731_p5 = por %p1730_p4, %p1729_p1 }
 0x21b   : > { %p1727_p0 = pneg %p1726_p13 }
 0x21d   : > { %1446 = vmatmul.msk.bf16.gmra.mxu0 %vm604_vm3, %v1546_v16  ;;  %1476 = vmatmul.msk.bf16.gmra.mxu1 %vm604_vm3, %v1540_v17  ;;  %p1732_p6 = pnand %p1731_p5, %p1727_p0 }
 0x21e   : > { %1507 = vmatmul.msk.bf16.gmra.mxu2 %vm604_vm3, %v1552_v18 }
 0x22d   : > { %1447 = vmatmul.msk.bf16.gmra.mxu0 %vm604_vm3, %v1547_v19  ;;  %1477 = vmatmul.msk.bf16.gmra.mxu1 %vm604_vm3, %v1541_v20 }
 0x22e   : > { %1508 = vmatmul.msk.bf16.gmra.mxu2 %vm604_vm3, %v1553_v21 }
 0x23d   : > { %1448 = vmatmul.msk.bf16.gmra.mxu0 %vm604_vm3, %v1548_v22  ;;  %1478 = vmatmul.msk.bf16.gmra.mxu1 %vm604_vm3, %v1542_v23 }
 0x23e   : > { %1509 = vmatmul.msk.bf16.gmra.mxu2 %vm604_vm3, %v1554_v24 }
 0x24d   : > { %1449 = vmatmul.msk.bf16.gmra.mxu0 %vm604_vm3, %v1549_v25  ;;  %1479 = vmatmul.msk.bf16.gmra.mxu1 %vm604_vm3, %v1543_v26 }
 0x24e   : > { %1510 = vmatmul.msk.bf16.gmra.mxu2 %vm604_vm3, %v1555_v27 }
 0x25d   : > { %1450 = vmatmul.msk.bf16.gmra.mxu0 %vm604_vm3, %v1550_v28  ;;  %1480 = vmatmul.msk.bf16.gmra.mxu1 %vm604_vm3, %v1544_v29 }
 0x25e   : > { %1511 = vmatmul.msk.bf16.gmra.mxu2 %vm604_vm3, %v1556_v30 }
 0x28a   : > { %v636_v31 = vpop.f32.mrf.mxu0  ;;  %v726_v32 = vpop.f32.mrf.mxu1 }
 0x28b   : > { %v727_v33 = vadd.f32 %v726_v32, %v636_v31 }
 0x291   : > { %v831_v34 = vpop.f32.mrf.mxu2 }
 0x292   : > { %v2113_v35 = vadd.f32 %v831_v34, %v727_v33  ;;  %v638_v36 = vpop.f32.mrf.mxu0  ;;  %v728_v37 = vpop.f32.mrf.mxu1 }
 0x293   : > { %v729_v38 = vadd.f32 %v728_v37, %v638_v36 }
 0x294   : > { %972 = vrot.lane.b32.xlu0 %v2113_v35, %s1837_s27  ;;  %v873_v7 = vrot.slane %v2113_v35, 7 }
 0x299   : > { %v833_v39 = vpop.f32.mrf.mxu2 }
 0x29a   : > { %v2117_v40 = vadd.f32 %v833_v39, %v729_v38  ;;  %v641_v41 = vpop.f32.mrf.mxu0  ;;  %v731_v42 = vpop.f32.mrf.mxu1 }
 0x29b   : > { %v732_v43 = vadd.f32 %v731_v42, %v641_v41 }
 0x29c   : > { %974 = vrot.lane.b32.xlu0 %v2117_v40, %s1837_s27  ;;  %v874_v3 = vrot.slane %v2117_v40, 7 }
 0x29e   : > { %v898_v12 = vsel %vm887_vm4, %v873_v7, %v874_v3 }
 0x2a1   : > { %v836_v44 = vpop.f32.mrf.mxu2 }
 0x2a2   : > { %v2121_v45 = vadd.f32 %v836_v44, %v732_v43  ;;  %v643_v46 = vpop.f32.mrf.mxu0  ;;  %v733_v47 = vpop.f32.mrf.mxu1 }
 0x2a3   : > { %v734_v48 = vadd.f32 %v733_v47, %v643_v46 }
 0x2a4   : > { %976 = vrot.lane.b32.xlu1 %v2121_v45, %s1837_s27  ;;  %v875_v20 = vrot.slane %v2121_v45, 7 }
 0x2a6   : > { %v897_v25 = vsel %vm887_vm4, %v874_v3, %v875_v20 }
 0x2a9   : > { %v838_v49 = vpop.f32.mrf.mxu2 }
 0x2aa   : > { %v2125_v50 = vadd.f32 %v838_v49, %v734_v48  ;;  %v646_v51 = vpop.f32.mrf.mxu0  ;;  %v736_v52 = vpop.f32.mrf.mxu1 }
 0x2ab   : > { %v737_v53 = vadd.f32 %v736_v52, %v646_v51 }
 0x2ac   : > { %978 = vrot.lane.b32.xlu1 %v2125_v50, %s1837_s27 }
 0x2b1   : > { %v841_v54 = vpop.f32.mrf.mxu2 }
 0x2b2   : > { %v2129_v55 = vadd.f32 %v841_v54, %v737_v53  ;;  %v648_v56 = vpop.f32.mrf.mxu0  ;;  %v738_v57 = vpop.f32.mrf.mxu1  ;;  %v876_v54 = vrot.slane %v2125_v50, 7 }
 0x2b3   : > { %v739_v58 = vadd.f32 %v738_v57, %v648_v56 }
 0x2b4   : > { %980 = vrot.lane.b32.xlu2 %v2129_v55, %s1837_s27  ;;  %v896_v59 = vsel %vm887_vm4, %v875_v20, %v876_v54 }
 0x2b9   : > { %v843_v60 = vpop.f32.mrf.mxu2 }
 0x2ba   : > { %v2133_v61 = vadd.f32 %v843_v60, %v739_v58  ;;  %v651_v62 = vpop.f32.mrf.mxu0  ;;  %v741_v63 = vpop.f32.mrf.mxu1 }
 0x2bb   : > { %v742_v1 = vadd.f32 %v741_v63, %v651_v62  ;;  %v877_v62 = vrot.slane %v2129_v55, 7 }
 0x2bc   : > { %982 = vrot.lane.b32.xlu2 %v2133_v61, %s1837_s27  ;;  %v878_v3 = vrot.slane %v2133_v61, 7 }
 0x2c1   : > { %v846_v8 = vpop.f32.mrf.mxu2 }
 0x2c2   : > { %v2142_v9 = vadd.f32 %v846_v8, %v742_v1  ;;  %v653_v10 = vpop.f32.mrf.mxu0  ;;  %v743_v11 = vpop.f32.mrf.mxu1  ;;  %v895_v1 = vsel %vm887_vm4, %v876_v54, %v877_v62 }
 0x2c3   : > { %v744_v13 = vadd.f32 %v743_v11, %v653_v10 }
 0x2c4   : > { %984 = vrot.lane.b32.xlu0 %v2142_v9, %s1837_s27  ;;  %914 = vrot.lane.b32.xlu2 %v898_v12, %s1838_s20 }
 0x2c9   : > { %v848_v15 = vpop.f32.mrf.mxu2 }
 0x2ca   : > { %v2152_v16 = vadd.f32 %v848_v15, %v744_v13  ;;  %v656_v17 = vpop.f32.mrf.mxu0  ;;  %v746_v18 = vpop.f32.mrf.mxu1  ;;  %v879_v15 = vrot.slane %v2142_v9, 7 }
 0x2cb   : > { %v747_v19 = vadd.f32 %v746_v18, %v656_v17 }
 0x2cc   : > { %1096 = vrot.lane.b32.xlu2 %v1676_v14, %s1838_s20  ;;  %v880_v17 = vrot.slane %v2152_v16, 7  ;;  %v893_v18 = vsel %vm887_vm4, %v878_v3, %v879_v15 }
 0x2d1   : > { %v851_v21 = vpop.f32.mrf.mxu2 }
 0x2d2   : > { %v2156_v22 = vadd.f32 %v851_v21, %v747_v19  ;;  %v658_v23 = vpop.f32.mrf.mxu0  ;;  %v748_v24 = vpop.f32.mrf.mxu1  ;;  %v892_v19 = vsel %vm887_vm4, %v879_v15, %v880_v17 }
 0x2d3   : > { %v749_v26 = vadd.f32 %v748_v24, %v658_v23 }
 0x2d4   : > { %916 = vrot.lane.b32.xlu2 %v897_v25, %s1838_s20 }
 0x2d9   : > { %v853_v27 = vpop.f32.mrf.mxu2 }
 0x2da   : > { %v2161_v28 = vadd.f32 %v853_v27, %v749_v26  ;;  %v661_v29 = vpop.f32.mrf.mxu0  ;;  %v751_v30 = vpop.f32.mrf.mxu1 }
 0x2db   : > { %v752_v31 = vadd.f32 %v751_v30, %v661_v29 }
 0x2e1   : > { %v856_v32 = vpop.f32.mrf.mxu2 }
 0x2e2   : > { %v2163_v33 = vadd.f32 %v856_v32, %v752_v31  ;;  %v663_v34 = vpop.f32.mrf.mxu0  ;;  %v753_v36 = vpop.f32.mrf.mxu1 }
 0x2e3   : > { %v754_v37 = vadd.f32 %v753_v36, %v663_v34 }
 0x2e9   : > { %v858_v38 = vpop.f32.mrf.mxu2 }
 0x2ea   : > { %v2165_v39 = vadd.f32 %v858_v38, %v754_v37 }
 0x2ec   : > { %v884_v41 = vrot.slane %v2165_v39, 7 }
 0x2ee   : > { %v899_v42 = vsel %vm887_vm4, %v884_v41, %v873_v7  ;;  %v894_v7 = vsel %vm887_vm4, %v877_v62, %v878_v3 }
 0x2ef   : > { %912 = vrot.lane.b32.xlu1 %v899_v42, %s1838_s20 }
 0x306   : > { %v2173_v43 = vpop.permute.xlu0 %972 }
 0x307   : > { %v1008_v46 = vrot.slane %v2173_v43, 1 }
 0x30e   : > { %v975_v44 = vpop.permute.xlu0 %974  ;;  %v981_v53 = vpop.permute.xlu2 %980 }
 0x30f   : > { %v1009_v47 = vrot.slane %v975_v44, 1  ;;  %v1012_v56 = vrot.slane %v981_v53, 1 }
 0x311   : > { %v1031_v48 = vsel %vm1020_vm5, %v1008_v46, %v1009_v47 }
 0x312   : > { %1045 = vrot.lane.b32.xlu0 %v1031_v48, %s1838_s20 }
 0x316   : > { %v977_v49 = vpop.permute.xlu1 %976  ;;  %v983_v8 = vpop.permute.xlu2 %982 }
 0x317   : > { %v1010_v51 = vrot.slane %v977_v49, 1  ;;  %v1013_v10 = vrot.slane %v983_v8, 1  ;;  %v881_v49 = vrot.slane %v2156_v22, 7 }
 0x319   : > { %v1030_v52 = vsel %vm1020_vm5, %v1009_v47, %v1010_v51  ;;  %v1027_v13 = vsel %vm1020_vm5, %v1012_v56, %v1013_v10 }
 0x31a   : > { %986 = vrot.lane.b32.xlu0 %v2152_v16, %s1837_s27  ;;  %1047 = vrot.lane.b32.xlu1 %v1030_v52, %s1838_s20 }
 0x31e   : > { %v979_v57 = vpop.permute.xlu1 %978  ;;  %v915_v20 = vpop.permute.xlu2 %914 }
 0x31f   : > { %v1011_v58 = vrot.slane %v979_v57, 1  ;;  %v949_v27 = vadd.f32 %v915_v20, %v2117_v40 }
 0x321   : > { %v1028_v60 = vsel %vm1020_vm5, %v1011_v58, %v1012_v56  ;;  %v1029_v63 = vsel %vm1020_vm5, %v1010_v51, %v1011_v58 }
 0x322   : > { %918 = vrot.lane.b32.xlu0 %v896_v59, %s1838_s20  ;;  %988 = vrot.lane.b32.xlu1 %v2156_v22, %s1837_s27 }
 0x323   : > { %1051 = vrot.lane.b32.xlu2 %v1028_v60, %s1838_s20  ;;  %v891_v60 = vsel %vm887_vm4, %v880_v17, %v881_v49 }
 0x326   : > { %v2227_v21 = vpop.permute.xlu2 %1096 }
 0x32a   : > { %990 = vrot.lane.b32.xlu0 %v2161_v28, %s1837_s27  ;;  %1049 = vrot.lane.b32.xlu1 %v1029_v63, %s1838_s20 }
 0x32b   : > { %920 = vrot.lane.b32.xlu2 %v895_v1, %s1838_s20 }
 0x32e   : > { %v917_v36 = vpop.permute.xlu2 %916 }
 0x32f   : > { %v950_v58 = vadd.f32 %v917_v36, %v2121_v45 }
 0x332   : > { %922 = vrot.lane.b32.xlu0 %v894_v7, %s1838_s20  ;;  %992 = vrot.lane.b32.xlu1 %v2163_v33, %s1837_s27 }
 0x336   : > { %v985_v11 = vpop.permute.xlu0 %984 }
 0x337   : > { %v1014_v12 = vrot.slane %v985_v11, 1 }
 0x339   : > { %v1026_v14 = vsel %vm1020_vm5, %v1013_v10, %v1014_v12 }
 0x33a   : > { %994 = vrot.lane.b32.xlu0 %v2165_v39, %s1837_s27  ;;  %1053 = vrot.lane.b32.xlu1 %v1027_v13, %s1838_s20 }
 0x33b   : > { %1055 = vrot.lane.b32.xlu2 %v1026_v14, %s1838_s20 }
 0x342   : > { %924 = vrot.lane.b32.xlu1 %v893_v18, %s1838_s20  ;;  %v883_v18 = vrot.slane %v2163_v33, 7 }
 0x343   : > { %926 = vrot.lane.b32.xlu2 %v892_v19, %s1838_s20 }
 0x361   : > { %v913_v23 = vpop.permute.xlu1 %912 }
 0x362   : > { %v948_v25 = vadd.f32 %v913_v23, %v2113_v35  ;;  %v882_v35 = vrot.slane %v2161_v28, 7 }
 0x364   : > { %v890_v54 = vsel %vm887_vm4, %v881_v49, %v882_v35 }
 0x37d   : > { %v1052_v53 = vpop.permute.xlu2 %1051 }
 0x384   : > { %v1046_v24 = vpop.permute.xlu0 %1045 }
 0x385   : > { %v1081_v26 = vadd.f32 %v1046_v24, %v948_v25  ;;  %v921_v3 = vpop.permute.xlu2 %920  ;;  %v889_v25 = vsel %vm887_vm4, %v882_v35, %v883_v18 }
 0x386   : > { %v952_v23 = vadd.f32 %v921_v3, %v2129_v55 }
 0x387   : > { %v1099_v31 = vadd.f32 %v2227_v21, %v1081_v26 }
 0x389   : > { %v1111_v42 = vmax.f32 %v1099_v31, 0.0 }
 0x38c   : > { %v987_v29 = vpop.permute.xlu0 %986  ;;  %v1048_v30 = vpop.permute.xlu1 %1047 }
 0x38d   : > { %v1015_v32 = vrot.slane %v987_v29, 1  ;;  %v1082_v34 = vadd.f32 %v1048_v30, %v949_v27 }
 0x38f   : > { %v1100_v37 = vadd.f32 %v2227_v21, %v1082_v34  ;;  %v1025_v38 = vsel %vm1020_vm5, %v1014_v12, %v1015_v32 }
 0x390   : > { %1057 = vrot.lane.b32.xlu1 %v1025_v38, %s1838_s20 }
 0x391   : > { %v1112_v44 = vmax.f32 %v1100_v37, 0.0  ;;  %v1129_v37 = vld [vmem:[%s2393_s5] sm:$0x3] }
 0x392   : > { %v1171_v38 = vsel %vm623_vm2, %v1129_v37, 0 }
 0x393   : > { %v1123_v47 = vpack.c.bf16 %v1112_v44, %v1111_v42  ;;  %1180 = vmatpush.bf16.msra.mxu3 %v1171_v38 }
 0x394   : > { %v919_v40 = vpop.permute.xlu0 %918  ;;  %v989_v48 = vpop.permute.xlu1 %988 }
 0x395   : > { %v951_v51 = vadd.f32 %v919_v40, %v2125_v50  ;;  %v1016_v52 = vrot.slane %v989_v48, 1  ;;  %1140 = vrot.lane.b32.xlu0 %v1123_v47, %s1839_s23  ;;  %v1056_v19 = vpop.permute.xlu2 %1055 }
 0x397   : > { %v1024_v56 = vsel %vm1020_vm5, %v1015_v32, %v1016_v52  ;;  %v1084_v57 = vadd.f32 %v1052_v53, %v951_v51 }
 0x398   : > { %930 = vrot.lane.b32.xlu1 %v890_v54, %s1838_s20  ;;  %1059 = vrot.lane.b32.xlu2 %v1024_v56, %s1838_s20 }
 0x399   : > { %v1102_v62 = vadd.f32 %v2227_v21, %v1084_v57 }
 0x39b   : > { %v1114_v8 = vmax.f32 %v1102_v62, 0.0 }
 0x39c   : > { %v991_v59 = vpop.permute.xlu0 %990  ;;  %v1050_v50 = vpop.permute.xlu1 %1049 }
 0x39d   : > { %v1083_v63 = vadd.f32 %v1050_v50, %v950_v58  ;;  %928 = vrot.lane.b32.xlu0 %v891_v60, %s1838_s20  ;;  %v1017_v7 = vrot.slane %v991_v59, 1  ;;  %v927_v43 = vpop.permute.xlu2 %926 }
 0x39f   : > { %v1101_v1 = vadd.f32 %v2227_v21, %v1083_v63  ;;  %v1023_v45 = vsel %vm1020_vm5, %v1016_v52, %v1017_v7 }
 0x3a1   : > { %v1113_v10 = vmax.f32 %v1101_v1, 0.0 }
 0x3a3   : > { %v1124_v11 = vpack.c.bf16 %v1114_v8, %v1113_v10 }
 0x3a4   : > { %v923_v12 = vpop.permute.xlu0 %922  ;;  %v993_v13 = vpop.permute.xlu1 %992 }
 0x3a5   : > { %v953_v14 = vadd.f32 %v923_v12, %v2133_v61  ;;  %v1018_v15 = vrot.slane %v993_v13, 1  ;;  %1061 = vrot.lane.b32.xlu0 %v1023_v45, %s1838_s20  ;;  %1142 = vrot.lane.b32.xlu2 %v1124_v11, %s1839_s23  ;;  %v888_v61 = vsel %vm887_vm4, %v883_v18, %v884_v41 }
 0x3a7   : > { %v1022_v17 = vsel %vm1020_vm5, %v1017_v7, %v1018_v15  ;;  %v1086_v20 = vadd.f32 %v1056_v19, %v953_v14 }
 0x3a8   : > { %1063 = vrot.lane.b32.xlu1 %v1022_v17, %s1838_s20 }
 0x3a9   : > { %v1104_v26 = vadd.f32 %v2227_v21, %v1086_v20 }
 0x3ab   : > { %v1116_v31 = vmax.f32 %v1104_v26, 0.0 }
 0x3ac   : > { %v1054_v24 = vpop.permute.xlu1 %1053  ;;  %v995_v27 = vpop.permute.xlu0 %994 }
 0x3ad   : > { %v1085_v29 = vadd.f32 %v1054_v24, %v952_v23  ;;  %934 = vrot.lane.b32.xlu0 %v888_v61, %s1838_s20  ;;  %932 = vrot.lane.b32.xlu2 %v889_v25, %s1838_s20  ;;  %v1019_v55 = vrot.slane %v995_v27, 1  ;;  %v1208_v24 = vunpack.c.l.bf16 %v2019_v2 }
 0x3af   : > { %v1103_v30 = vadd.f32 %v2227_v21, %v1085_v29  ;;  %v1032_v41 = vsel %vm1020_vm5, %v1019_v55, %v1008_v46  ;;  %v1021_v36 = vsel %vm1020_vm5, %v1018_v15, %v1019_v55  ;;  %v955_v46 = vadd.f32 %v927_v43, %v2152_v16 }
 0x3b0   : > { %v1209_v29 = vunpack.c.h.bf16 %v2019_v2  ;;  %v1211_v2 = vunpack.c.h.bf16 %v2023_v4 }
 0x3b1   : > { %v1115_v32 = vmax.f32 %v1103_v30, 0.0 }
 0x3b3   : > { %v1125_v34 = vpack.c.bf16 %v1116_v31, %v1115_v32 }
 0x3b4   : > { %v925_v42 = vpop.permute.xlu1 %924 }
 0x3b5   : > { %1067 = vrot.lane.b32.xlu0 %v1032_v41, %s1838_s20  ;;  %1065 = vrot.lane.b32.xlu2 %v1021_v36, %s1838_s20  ;;  %v954_v35 = vadd.f32 %v925_v42, %v2142_v9  ;;  %v1210_v36 = vunpack.c.l.bf16 %v2023_v4  ;;  %v1213_v4 = vunpack.c.h.bf16 %v2026_v5 }
 0x3b6   : > { %1144 = vrot.lane.b32.xlu1 %v1125_v34, %s1839_s23 }
 0x3f2   : > { %v1060_v44 = vpop.permute.xlu2 %1059 }
 0x3f3   : > { %v1088_v0 = vadd.f32 %v1060_v44, %v955_v46 }
 0x3f5   : > { %v1106_v40 = vadd.f32 %v2227_v21, %v1088_v0 }
 0x3f7   : > { %v1118_v51 = vmax.f32 %v1106_v40, 0.0  ;;  %v1212_v40 = vunpack.c.l.bf16 %v2026_v5  ;;  %v1215_v5 = vunpack.c.h.bf16 %v2029_v6 }
 0x3ff   : > { %v1143_v56 = vpop.permute.xlu2 %1142 }
 0x402   : > { %v1058_v47 = vpop.permute.xlu1 %1057 }
 0x403   : > { %v1087_v48 = vadd.f32 %v1058_v47, %v954_v35 }
 0x405   : > { %v1105_v49 = vadd.f32 %v2227_v21, %v1087_v48 }
 0x407   : > { %v1117_v52 = vmax.f32 %v1105_v49, 0.0  ;;  %v1141_v53 = vpop.permute.xlu0 %1140  ;;  %v933_v9 = vpop.permute.xlu2 %932 }
 0x408   : > { %1512 = vmatmul.msk.bf16.vlgmr.msra.gmra.mxu3 %vm604_vm3, %v1141_v53 }
 0x409   : > { %v1126_v54 = vpack.c.bf16 %v1118_v51, %v1117_v52 }
 0x40a   : > { %v931_v16 = vpop.permute.xlu1 %930 }
 0x40b   : > { %1146 = vrot.lane.b32.xlu1 %v1126_v54, %s1839_s23  ;;  %v957_v60 = vadd.f32 %v931_v16, %v2161_v28 }
 0x40f   : > { %v929_v57 = vpop.permute.xlu0 %928  ;;  %v1066_v11 = vpop.permute.xlu2 %1065 }
 0x410   : > { %v956_v58 = vadd.f32 %v929_v57, %v2156_v22  ;;  %v958_v22 = vadd.f32 %v933_v9, %v2163_v33 }
 0x412   : > { %v1091_v13 = vadd.f32 %v1066_v11, %v958_v22 }
 0x414   : > { %v1109_v28 = vadd.f32 %v2227_v21, %v1091_v13 }
 0x416   : > { %v1121_v19 = vmax.f32 %v1109_v28, 0.0 }
 0x417   : > { %v1062_v59 = vpop.permute.xlu0 %1061 }
 0x418   : > { %v1089_v50 = vadd.f32 %v1062_v59, %v956_v58  ;;  %1513 = vmatmul.msk.bf16.gmra.mxu3 %vm604_vm3, %v1143_v56  ;;  %v1214_v58 = vunpack.c.l.bf16 %v2029_v6 }
 0x41a   : > { %v1064_v62 = vpop.permute.xlu1 %1063  ;;  %v1107_v63 = vadd.f32 %v2227_v21, %v1089_v50 }
 0x41b   : > { %v1090_v1 = vadd.f32 %v1064_v62, %v957_v60 }
 0x41c   : > { %v1119_v7 = vmax.f32 %v1107_v63, 0.0 }
 0x41d   : > { %v1108_v3 = vadd.f32 %v2227_v21, %v1090_v1 }
 0x41f   : > { %v1120_v8 = vmax.f32 %v1108_v3, 0.0  ;;  %v935_v10 = vpop.permute.xlu0 %934 }
 0x420   : > { %v959_v45 = vadd.f32 %v935_v10, %v2165_v39  ;;  %v1677_v39 = vld [vmem:[%s2394_s6] ss:$0 sm:$0xff] }
 0x421   : > { %v1127_v12 = vpack.c.bf16 %v1120_v8, %v1119_v7 }
 0x423   : > { %1148 = vrot.lane.b32.xlu2 %v1127_v12, %s1839_s23 }
 0x427   : > { %v1068_v14 = vpop.permute.xlu0 %1067 }
 0x428   : > { %v1092_v15 = vadd.f32 %v1068_v14, %v959_v45  ;;  %v1145_v17 = vpop.permute.xlu1 %1144 }
 0x429   : > { %1514 = vmatmul.msk.bf16.gmra.mxu3 %vm604_vm3, %v1145_v17 }
 0x42a   : > { %v1110_v18 = vadd.f32 %v2227_v21, %v1092_v15 }
 0x42c   : > { %v1122_v20 = vmax.f32 %v1110_v18, 0.0 }
 0x42e   : > { %v1128_v23 = vpack.c.bf16 %v1122_v20, %v1121_v19 }
 0x430   : > { %1150 = vrot.lane.b32.xlu0 %v1128_v23, %s1839_s23 }
 0x47d   : > { %v1147_v33 = vpop.permute.xlu1 %1146  ;;  %v1149_v26 = vpop.permute.xlu2 %1148 }
 0x47e   : > { %1515 = vmatmul.msk.bf16.gmra.mxu3 %vm604_vm3, %v1147_v33 }
 0x48b   : > { %v1182_v61 = vpop.f32.mrf.mxu3 }
 0x48c   : > { %v1183_v25 = vadd.f32 %v1677_v39, %v1182_v61 }
 0x48e   : > { %v1216_v27 = vadd.f32 %v1208_v24, %v1183_v25  ;;  %1516 = vmatmul.msk.bf16.gmra.mxu3 %vm604_vm3, %v1149_v26 }
 0x490   : > { %v1224_v21 = vmax.f32 %v1216_v27, 0.0 }
 0x492   : > { %1232 = vst.msk [vmem:[%s2050_s16] sm:$0xff] %vm366_vm1, %v1224_v21 }
 0x493   : > { %v1184_v30 = vpop.f32.mrf.mxu3 }
 0x494   : > { %v1185_v55 = vadd.f32 %v1677_v39, %v1184_v30 }
 0x496   : > { %v1217_v31 = vadd.f32 %v1209_v29, %v1185_v55 }
 0x498   : > { %v1225_v32 = vmax.f32 %v1217_v31, 0.0 }
 0x49a   : > { %1233 = vst.msk [vmem:[%s2050_s16 + $0x8] sm:$0xff] %vm366_vm1, %v1225_v32 }
 0x49b   : > { %v1187_v34 = vpop.f32.mrf.mxu3 }
 0x4a2   : > { %v1151_v41 = vpop.permute.xlu0 %1150 }
 0x4a3   : > { %v1188_v37 = vpop.f32.mrf.mxu3  ;;  %1517 = vmatmul.msk.bf16.gmra.mxu3 %vm604_vm3, %v1151_v41 }
 0x4a4   : > { %v1189_v38 = vadd.f32 %v1677_v39, %v1188_v37 }
 0x4a6   : > { %v1218_v43 = vadd.f32 %v1210_v36, %v1189_v38 }
 0x4a8   : > { %v1226_v42 = vmax.f32 %v1218_v43, 0.0 }
 0x4aa   : > { %1234 = vst.msk [vmem:[%s2050_s16 + $0x10] sm:$0xff] %vm366_vm1, %v1226_v42 }
 0x4ac   : > { %v1191_v44 = vpop.f32.mrf.mxu3 }
 0x4ad   : > { %v1192_v46 = vadd.f32 %v1677_v39, %v1191_v44 }
 0x4af   : > { %v1219_v0 = vadd.f32 %v1211_v2, %v1192_v46 }
 0x4b1   : > { %v1227_v35 = vmax.f32 %v1219_v0, 0.0 }
 0x4b3   : > { %1235 = vst.msk [vmem:[%s2050_s16 + $0x18] sm:$0xff] %vm366_vm1, %v1227_v35 }
 0x4b4   : > { %v1193_v47 = vpop.f32.mrf.mxu3 }
 0x501   : > { %v1195_v48 = vpop.f32.mrf.mxu3 }
 0x502   : > { %v1196_v49 = vadd.f32 %v1677_v39, %v1195_v48 }
 0x504   : > { %v1220_v51 = vadd.f32 %v1212_v40, %v1196_v49 }
 0x506   : > { %v1228_v52 = vmax.f32 %v1220_v51, 0.0 }
 0x508   : > { %1236 = vst.msk [vmem:[%s2050_s16 + $0x20] sm:$0xff] %vm366_vm1, %v1228_v52 }
 0x509   : > { %v1197_v53 = vpop.f32.mrf.mxu3 }
 0x50a   : > { %v1198_v54 = vadd.f32 %v1677_v39, %v1197_v53 }
 0x50c   : > { %v1221_v56 = vadd.f32 %v1213_v4, %v1198_v54 }
 0x50e   : > { %v1229_v57 = vmax.f32 %v1221_v56, 0.0 }
 0x510   : > { %1237 = vst.msk [vmem:[%s2050_s16 + $0x28] sm:$0xff] %vm366_vm1, %v1229_v57 }
 0x511   : > { %v1200_v16 = vpop.f32.mrf.mxu3 }
 0x519   : > { %v1201_v9 = vpop.f32.mrf.mxu3 }
 0x51a   : > { %v1202_v59 = vadd.f32 %v1677_v39, %v1201_v9 }
 0x51c   : > { %v1222_v50 = vadd.f32 %v1214_v58, %v1202_v59 }
 0x51e   : > { %v1230_v60 = vmax.f32 %v1222_v50, 0.0 }
 0x520   : > { %1238 = vst.msk [vmem:[%s2050_s16 + $0x30] sm:$0xff] %vm366_vm1, %v1230_v60 }
 0x526   : > { %v1204_v62 = vpop.f32.mrf.mxu3 }
 0x527   : > { %v1205_v63 = vadd.f32 %v1677_v39, %v1204_v62 }
 0x529   : > { %v1223_v1 = vadd.f32 %v1215_v5, %v1205_v63 }
 0x52b   : > { %v1231_v3 = vmax.f32 %v1223_v1, 0.0 }
 0x52d   : > { %1239 = vst.msk [vmem:[%s2050_s16 + $0x38] sm:$0xff] %vm366_vm1, %v1231_v3 }
 0x52e   : > { %v1206_v7 = vpop.f32.mrf.mxu3 }
 0x52f   : > { %1735 = shalt.err (!%p1732_p6)
}
 0x530   : > { %s1840_s7 = smov 128   ;;  %s1841_s16 = smov 8  }
 0x531   : > { %1563 = dma.vmem_to_hbm [thread:$0]  (%p1964_p12), %s1257_s14, 1024, %s1259_s30, %s1241_s8, %s1840_s7, %s1840_s7, %s1841_s16  }
 0x532 PF: > { %p1574_p8 = scmp.ge.s32.totalorder %s1830_s11, 2  ;;  %s1273_s27 = sand.u32 1, %s1790_s24  }
 0x533   : > { %s1274_s20 = scalar_lea.sflag [#allocation5], %s1273_s27 }
 0x534   : > { %p1570_p3 = pnand %p1574_p8, %p1977_p2 }
 0x536   : > { %p1571_p7 = pneg %p1570_p3 }
 0x538   : > { %1785 = dma.done.wait (%p1571_p7), %s1274_s20, 1024  }
 0x539   : > { %1787 = vsyncadd (%p1571_p7), %s1274_s20, 4294966272  ;;  %s23_s11 = sadd.s32 1, %s1830_s11   ;;  %s2417_s15 = sld [smem:[#allocation15_spill]] }
 0x53a   : > { %p20_p9 = scmp.ge.s32.totalorder %s23_s11, 10   ;;  %s2418_s23 = sld [smem:[#allocation14_spill]] }
 0x53b   : > { %s2419_s30 = sld [smem:[#allocation9_spill]]  ;;  %s2423_s24 = smov %s1794_s25 }
 0x53c   : > { %s2420_s8 = sld [smem:[#allocation10_spill]]  ;;  %s2424_s25 = smov %s1798_s26 }
 0x53d   : > { %s2421_s9 = sld [smem:[#allocation11_spill]]  ;;  %s2426_s27 = smov %s1806_s28 }
 0x53e   : > { %s2422_s10 = sld [smem:[#allocation12_spill]]  ;;  %s2427_s28 = smov %s1810_s29 }
 0x53f   : > { %s2425_s26 = smov %s2417_s15  ;;  %22 = sbr.rel (!%p20_p9) target bundleno = 11 (0xb), region = 118 }
 0x540   : > { %s2428_s29 = smov %s2418_s23 }
 0x544   :  { %1280 = vsyncpa [#allocation4], 1 }
 0x545   :  { %1282 = vsyncpa [#allocation4 + $0x1], 1 }
 0x546   :  { %1283 = vsyncpa [#allocation5], 1 }
 0x547   :  { %1285 = vsyncpa [#allocation5 + $0x1], 1 }

</bundles_post_ra>
